<compile_context>
chip_gen: v5e
topology: v5e:2x2
jax: 0.10.0
libtpu: 0.0.40
codegen_flags: <defaults>
</compile_context>

<pallas_src>
import jax
import jax.numpy as jnp
from jax.experimental import pallas as pl
from jax.experimental.pallas import tpu as pltpu

# Logical sizes (PyTorch module).
IN_F = 28 * 28   # 784
H1 = 312
H2 = 256
OUT = 10

# Lane-dense padded sizes (multiples of 128) for the ragged weight dims only.
H1_PAD = 384     # 312 -> 3*128
OUT_PAD = 128    # 10  -> 128


def _round_up(x, m):
    return (x + m - 1) // m * m


def _pick_tb(b):
    """Batch tile size. `b` is already a multiple of 8.

    Small b -> one tile. Large b -> biggest tile in {1024,512,256,128} that keeps
    >=2 grid steps (megacore) and <~12.5% ragged-last-block waste.
    """
    if b <= 256:
        return b
    for tb in (1024, 512, 256, 128):
        if pl.cdiv(b, tb) >= 2 and (pl.cdiv(b, tb) * tb - b) * 8 <= b:
            return tb
    return 128


def mlp_kernel(x_ref, w1_ref, b1_ref, w2_ref, b2_ref, w3_ref, b3_ref, o_ref):
    # x: (TB, 784) f32 -> cast to bf16 in-register (cheaper than a wrapper cast pass).
    x = x_ref[...].astype(jnp.bfloat16)
    h1 = jnp.dot(x, w1_ref[...], preferred_element_type=jnp.float32) + b1_ref[...]
    h1 = jnp.maximum(h1, 0.0).astype(jnp.bfloat16)
    h2 = jnp.dot(h1, w2_ref[...], preferred_element_type=jnp.float32) + b2_ref[...]
    h2 = jnp.maximum(h2, 0.0).astype(jnp.bfloat16)
    logits = jnp.dot(h2, w3_ref[...], preferred_element_type=jnp.float32) + b3_ref[...]
    o_ref[...] = logits.astype(o_ref.dtype)   # bf16 lane-dense writeback


def prepare_params(params):
    """ONE-TIME setup: pad ragged weight dims to 128-multiples, cast weights to bf16.

    Call once at model init and reuse the result for every forward call.
    """
    w1, b1, w2, b2, w3, b3 = params
    w1p = jnp.zeros((IN_F, H1_PAD), jnp.float32).at[:, :H1].set(w1).astype(jnp.bfloat16)
    b1p = jnp.zeros((1, H1_PAD), jnp.float32).at[:, :H1].set(b1)
    w2p = jnp.zeros((H1_PAD, H2), jnp.float32).at[:H1, :].set(w2).astype(jnp.bfloat16)
    b2p = b2.reshape(1, H2).astype(jnp.float32)
    w3p = jnp.zeros((H2, OUT_PAD), jnp.float32).at[:, :OUT].set(w3).astype(jnp.bfloat16)
    b3p = jnp.zeros((1, OUT_PAD), jnp.float32).at[:, :OUT].set(b3)
    return (w1p, b1p, w2p, b2p, w3p, b3p)


@jax.jit
def neural_network_forward(x_nchw, prepared_params):
    """x_nchw: (B, 1, 28, 28) float32, prepared_params from prepare_params().
    Returns logits (B, 10) float32."""
    w1p, b1p, w2p, b2p, w3p, b3p = prepared_params

    B = x_nchw.shape[0]
    x = x_nchw.reshape(B, IN_F)                       # nn.Flatten(): (B, 784)

    # Pad batch only to a sublane multiple; ragged last grid block handles the rest.
    B8 = _round_up(B, 8)
    if B8 != B:
        x = jnp.pad(x, ((0, B8 - B), (0, 0)))

    TB = _pick_tb(B8)
    grid = (pl.cdiv(B8, TB),)
    const = lambda i: (0, 0)      # weights/biases: same block every step -> VMEM-resident

    weight_bytes = (IN_F * H1_PAD + H1_PAD * H2 + H2 * OUT_PAD) * 2
    bias_bytes = (H1_PAD + H2 + OUT_PAD) * 4
    flops = 2 * B8 * (IN_F * H1_PAD + H1_PAD * H2 + H2 * OUT_PAD)
    bytes_accessed = B8 * IN_F * 4 + B8 * OUT_PAD * 2 + weight_bytes + bias_bytes

    # Explicit VMEM budget: double-buffered x/out tiles + (conservatively doubled)
    # resident weights + headroom for in-kernel intermediates.
    vmem_limit = int(2 * TB * IN_F * 4 + 2 * TB * OUT_PAD * 2
                     + 2 * (weight_bytes + bias_bytes) + 8 * 1024 * 1024)

    out_padded = pl.pallas_call(
        mlp_kernel,
        out_shape=jax.ShapeDtypeStruct((B8, OUT_PAD), jnp.bfloat16),
        grid=grid,
        in_specs=[
            pl.BlockSpec((TB, IN_F), lambda i: (i, 0)),     # x   (streamed f32 tile)
            pl.BlockSpec((IN_F, H1_PAD), const),            # w1  (resident)
            pl.BlockSpec((1, H1_PAD), const),               # b1
            pl.BlockSpec((H1_PAD, H2), const),              # w2
            pl.BlockSpec((1, H2), const),                   # b2
            pl.BlockSpec((H2, OUT_PAD), const),             # w3
            pl.BlockSpec((1, OUT_PAD), const),              # b3
        ],
        out_specs=pl.BlockSpec((TB, OUT_PAD), lambda i: (i, 0)),
        compiler_params=pltpu.CompilerParams(
            dimension_semantics=("parallel",),              # megacore-shard batch on v7x
            vmem_limit_bytes=vmem_limit,
        ),
        cost_estimate=pl.CostEstimate(
            flops=flops, transcendentals=0, bytes_accessed=bytes_accessed),
    )(x, w1p, b1p, w2p, b2p, w3p, b3p)

    return out_padded[:B, :OUT].astype(jnp.float32)


def init_params(key):
    """Deterministic init matching nn.Linear shapes (stored transposed: (in, out))."""
    def linear_init(k, fan_in, fan_out):
        kw, kb = jax.random.split(k)
        bound = 1.0 / jnp.sqrt(fan_in)
        w = jax.random.uniform(kw, (fan_in, fan_out), jnp.float32, -bound, bound)
        b = jax.random.uniform(kb, (1, fan_out), jnp.float32, -bound, bound)
        return w, b

    k1, k2, k3 = jax.random.split(key, 3)
    w1, b1 = linear_init(k1, IN_F, H1)
    w2, b2 = linear_init(k2, H1, H2)
    w3, b3 = linear_init(k3, H2, OUT)
    return (w1, b1, w2, b2, w3, b3)


if __name__ == "__main__":
    key = jax.random.PRNGKey(0)
    k_params, k_x = jax.random.split(key)
    params = init_params(k_params)
    prepared = prepare_params(params)      # one-time pad/cast, reused across calls

    B = 8
    x = jax.random.normal(k_x, (B, 1, 28, 28), jnp.float32)  # NCHW, MNIST-like

    logits = neural_network_forward(x, prepared)
    jax.block_until_ready(logits)

    # Sanity check against a plain-JAX reference computed at the same (bf16) precision.
    w1, b1, w2, b2, w3, b3 = params
    xf = x.reshape(B, -1)
    h = jnp.maximum(
        jnp.dot(xf.astype(jnp.bfloat16), w1.astype(jnp.bfloat16),
                preferred_element_type=jnp.float32) + b1, 0.0)
    h = jnp.maximum(
        jnp.dot(h.astype(jnp.bfloat16), w2.astype(jnp.bfloat16),
                preferred_element_type=jnp.float32) + b2, 0.0)
    ref = jnp.dot(h.astype(jnp.bfloat16), w3.astype(jnp.bfloat16),
                  preferred_element_type=jnp.float32) + b3

    assert logits.shape == (B, 10)
    assert logits.dtype == jnp.float32
    assert bool(jnp.allclose(logits, ref, atol=2e-2, rtol=2e-2))

    print("KERNEL_OK")
</pallas_src>

<mosaic_0001>
module attributes {stable_mosaic.version = 11 : i64} {
  func.func @mlp_kernel(%arg0: i32, %arg1: memref<8x784xf32, #tpu.memory_space<vmem>>, %arg2: memref<784x384xbf16, #tpu.memory_space<vmem>>, %arg3: memref<1x384xf32, #tpu.memory_space<vmem>>, %arg4: memref<384x256xbf16, #tpu.memory_space<vmem>>, %arg5: memref<1x256xf32, #tpu.memory_space<vmem>>, %arg6: memref<256x128xbf16, #tpu.memory_space<vmem>>, %arg7: memref<1x128xf32, #tpu.memory_space<vmem>>, %arg8: memref<8x128xbf16, #tpu.memory_space<vmem>>) attributes {dimension_semantics = [#tpu.dimension_semantics<parallel>], iteration_bounds = array<i64: 1>, scalar_prefetch = 0 : i64, scratch_operands = 0 : i64, tpu.core_type = #tpu.core_type<tc>, window_params = [{transform_indices = @transform_0, window_bounds = array<i64: 8, 784>}, {pipeline_mode = #tpu.pipeline_mode<synchronous>, transform_indices = @transform_1, window_bounds = array<i64: 784, 384>}, {pipeline_mode = #tpu.pipeline_mode<synchronous>, transform_indices = @transform_2, window_bounds = array<i64: 1, 384>}, {pipeline_mode = #tpu.pipeline_mode<synchronous>, transform_indices = @transform_3, window_bounds = array<i64: 384, 256>}, {pipeline_mode = #tpu.pipeline_mode<synchronous>, transform_indices = @transform_4, window_bounds = array<i64: 1, 256>}, {pipeline_mode = #tpu.pipeline_mode<synchronous>, transform_indices = @transform_5, window_bounds = array<i64: 256, 128>}, {pipeline_mode = #tpu.pipeline_mode<synchronous>, transform_indices = @transform_6, window_bounds = array<i64: 1, 128>}, {transform_indices = @transform_7, window_bounds = array<i64: 8, 128>}]} {
    %c0 = arith.constant 0 : index
    %c0_0 = arith.constant 0 : index
    %0 = vector.load %arg1[%c0, %c0_0] : memref<8x784xf32, #tpu.memory_space<vmem>>, vector<8x784xf32>
    %1 = arith.truncf %0 : vector<8x784xf32> to vector<8x784xbf16>
    %c0_1 = arith.constant 0 : index
    %c0_2 = arith.constant 0 : index
    %2 = vector.load %arg2[%c0_1, %c0_2] : memref<784x384xbf16, #tpu.memory_space<vmem>>, vector<784x384xbf16>
    %cst = arith.constant dense<0.000000e+00> : vector<8x384xf32>
    %3 = tpu.matmul %1, %2, %cst {dimension_numbers = #tpu.dot_dimension_numbers<[1], [0], [0], [1], [0, 0, 1, 1], [], []>} : vector<8x784xbf16>, vector<784x384xbf16>, vector<8x384xf32> -> vector<8x384xf32>
    %c0_3 = arith.constant 0 : index
    %c0_4 = arith.constant 0 : index
    %4 = vector.load %arg3[%c0_3, %c0_4] : memref<1x384xf32, #tpu.memory_space<vmem>>, vector<1x384xf32>
    %5 = vector.broadcast %4 : vector<1x384xf32> to vector<8x384xf32>
    %6 = arith.addf %3, %5 : vector<8x384xf32>
    %cst_5 = arith.constant 0.000000e+00 : f32
    %7 = vector.broadcast %cst_5 : f32 to vector<8x384xf32>
    %8 = arith.maximumf %6, %7 : vector<8x384xf32>
    %9 = arith.truncf %8 : vector<8x384xf32> to vector<8x384xbf16>
    %c0_6 = arith.constant 0 : index
    %c0_7 = arith.constant 0 : index
    %10 = vector.load %arg4[%c0_6, %c0_7] : memref<384x256xbf16, #tpu.memory_space<vmem>>, vector<384x256xbf16>
    %cst_8 = arith.constant dense<0.000000e+00> : vector<8x256xf32>
    %11 = tpu.matmul %9, %10, %cst_8 {dimension_numbers = #tpu.dot_dimension_numbers<[1], [0], [0], [1], [0, 0, 1, 1], [], []>} : vector<8x384xbf16>, vector<384x256xbf16>, vector<8x256xf32> -> vector<8x256xf32>
    %c0_9 = arith.constant 0 : index
    %c0_10 = arith.constant 0 : index
    %12 = vector.load %arg5[%c0_9, %c0_10] : memref<1x256xf32, #tpu.memory_space<vmem>>, vector<1x256xf32>
    %13 = vector.broadcast %12 : vector<1x256xf32> to vector<8x256xf32>
    %14 = arith.addf %11, %13 : vector<8x256xf32>
    %cst_11 = arith.constant 0.000000e+00 : f32
    %15 = vector.broadcast %cst_11 : f32 to vector<8x256xf32>
    %16 = arith.maximumf %14, %15 : vector<8x256xf32>
    %17 = arith.truncf %16 : vector<8x256xf32> to vector<8x256xbf16>
    %c0_12 = arith.constant 0 : index
    %c0_13 = arith.constant 0 : index
    %18 = vector.load %arg6[%c0_12, %c0_13] : memref<256x128xbf16, #tpu.memory_space<vmem>>, vector<256x128xbf16>
    %cst_14 = arith.constant dense<0.000000e+00> : vector<8x128xf32>
    %19 = tpu.matmul %17, %18, %cst_14 {dimension_numbers = #tpu.dot_dimension_numbers<[1], [0], [0], [1], [0, 0, 1, 1], [], []>} : vector<8x256xbf16>, vector<256x128xbf16>, vector<8x128xf32> -> vector<8x128xf32>
    %c0_15 = arith.constant 0 : index
    %c0_16 = arith.constant 0 : index
    %20 = vector.load %arg7[%c0_15, %c0_16] : memref<1x128xf32, #tpu.memory_space<vmem>>, vector<1x128xf32>
    %21 = vector.broadcast %20 : vector<1x128xf32> to vector<8x128xf32>
    %22 = arith.addf %19, %21 : vector<8x128xf32>
    %23 = arith.truncf %22 : vector<8x128xf32> to vector<8x128xbf16>
    %c0_17 = arith.constant 0 : index
    %c0_18 = arith.constant 0 : index
    %24 = vector.load %arg8[%c0_17, %c0_18] : memref<8x128xbf16, #tpu.memory_space<vmem>>, vector<8x128xbf16>
    tpu.vector_store %arg8[%c0_17, %c0_18], %23 {strides = array<i32>} : memref<8x128xbf16, #tpu.memory_space<vmem>>, vector<8x128xbf16>,
    return
  }
  func.func @transform_0(%arg0: i32) -> (i32, i32) {
    %c0_i32 = arith.constant 0 : i32
    %c0_i32_0 = arith.constant 0 : i32
    return %arg0, %c0_i32 : i32, i32
  }
  func.func @transform_1(%arg0: i32) -> (i32, i32) {
    %c0_i32 = arith.constant 0 : i32
    %c0_i32_0 = arith.constant 0 : i32
    %c0_i32_1 = arith.constant 0 : i32
    return %c0_i32, %c0_i32_0 : i32, i32
  }
  func.func @transform_2(%arg0: i32) -> (i32, i32) {
    %c0_i32 = arith.constant 0 : i32
    %c0_i32_0 = arith.constant 0 : i32
    %c0_i32_1 = arith.constant 0 : i32
    return %c0_i32, %c0_i32_0 : i32, i32
  }
  func.func @transform_3(%arg0: i32) -> (i32, i32) {
    %c0_i32 = arith.constant 0 : i32
    %c0_i32_0 = arith.constant 0 : i32
    %c0_i32_1 = arith.constant 0 : i32
    return %c0_i32, %c0_i32_0 : i32, i32
  }
  func.func @transform_4(%arg0: i32) -> (i32, i32) {
    %c0_i32 = arith.constant 0 : i32
    %c0_i32_0 = arith.constant 0 : i32
    %c0_i32_1 = arith.constant 0 : i32
    return %c0_i32, %c0_i32_0 : i32, i32
  }
  func.func @transform_5(%arg0: i32) -> (i32, i32) {
    %c0_i32 = arith.constant 0 : i32
    %c0_i32_0 = arith.constant 0 : i32
    %c0_i32_1 = arith.constant 0 : i32
    return %c0_i32, %c0_i32_0 : i32, i32
  }
  func.func @transform_6(%arg0: i32) -> (i32, i32) {
    %c0_i32 = arith.constant 0 : i32
    %c0_i32_0 = arith.constant 0 : i32
    %c0_i32_1 = arith.constant 0 : i32
    return %c0_i32, %c0_i32_0 : i32, i32
  }
  func.func @transform_7(%arg0: i32) -> (i32, i32) {
    %c0_i32 = arith.constant 0 : i32
    %c0_i32_0 = arith.constant 0 : i32
    return %arg0, %c0_i32 : i32, i32
  }
}

</mosaic_0001>

<bundles_post_ra>
// kernel: neural_network_forward.1
= control target key start
LH: loop header
LB: loop body
LE: loop exit
PB: predicated region body
PF: predicated region fallthrough
CT: control target
= control target key end

     0   :  { %12 = vsyncpa [#allocation3], 0  ;;  %s2957_s27 = smov [#allocation2]   ;;  %s2958_s29 = smov 192   ;;  %s3415_s0 = inlined_call_operand.vmem [shape: f32[8,784], index: 0, kind: input, shape index: {}]   ;;  %s3416_s1 = inlined_call_operand.hbm [shape: bf16[784,384], index: 1, kind: input, shape index: {}]   ;;  %s3417_s2 = inlined_call_operand.vmem [shape: f32[1,384], index: 2, kind: input, shape index: {}]   ;;  %s3418_s3 = inlined_call_operand.vmem [shape: bf16[384,256], index: 3, kind: input, shape index: {}]   ;;  %s3419_s4 = inlined_call_operand.vmem [shape: f32[1,256], index: 4, kind: input, shape index: {}]   ;;  %s3420_s5 = inlined_call_operand.vmem [shape: bf16[256,128], index: 5, kind: input, shape index: {}]   ;;  %s3421_s6 = inlined_call_operand.vmem [shape: f32[1,128], index: 6, kind: input, shape index: {}]   ;;  %s3422_s7 = inlined_call_operand.vmem [shape: bf16[8,128], index: 7, kind: output, shape index: {}]  }
   0x1   :  { %s19_s26 = sshll.u32 %s3416_s1, 4  ;;  %s21_s28 = sshll.u32 %s2957_s27, 4  ;;  %s20_s26 = int_to_ptr.hbm [resolvable:$true] %s19_s26  ;;  %s22_s28 = int_to_ptr.vmem [resolvable:$true] %s21_s28 }
   0x2   :  { %s2959_s30 = smov 12  }
   0x3   :  { %27 = dma.hbm_to_vmem [thread:$0]  %s20_s26, 18816, %s22_s28, [#allocation3], %s2958_s29, %s2958_s29, %s2959_s30  }
   0x4   :  { %2955 = dma.done.wait [#allocation3], 18816  }
   0x5   :  { %2956 = vsyncadd [#allocation3], 4294948480  ;;  %v1955_v0 = vld [vmem:[#allocation2 + $0xa8] sm:$0xf]  ;;  %v2738_v1 = vld [vmem:[#allocation2 + $0xb0] sm:$0xf0] }
   0x6   :  { %v2051_v2 = vld [vmem:[#allocation2 + $0x168] sm:$0xf]  ;;  %v1956_v3 = vor.u32 %v2738_v1, %v1955_v0  ;;  %v2762_v4 = vld [vmem:[#allocation2 + $0x170] sm:$0xf0]  ;;  %v1943_v9 = vld [vmem:[#allocation2 + $0x90] sm:$0xf] }
   0x7   :  { %v2243_v5 = vld [vmem:[#allocation2 + $0x2e8] sm:$0xf]  ;;  %v2810_v6 = vld [vmem:[#allocation2 + $0x2f0] sm:$0xf0]  ;;  %v2052_v7 = vor.u32 %v2762_v4, %v2051_v2  ;;  %v2735_v10 = vld [vmem:[#allocation2 + $0x98] sm:$0xf0] }
   0x8   :  { %v2244_v8 = vor.u32 %v2810_v6, %v2243_v5  ;;  %v2039_v11 = vld [vmem:[#allocation2 + $0x150] sm:$0xf]  ;;  %1049 = vmatpush.bf16.msra.mxu0 %v1956_v3  ;;  %v1944_v12 = vor.u32 %v2735_v10, %v1943_v9  ;;  %v2759_v13 = vld [vmem:[#allocation2 + $0x158] sm:$0xf0]  ;;  %v2147_v18 = vld [vmem:[#allocation2 + $0x228] sm:$0xf] }
   0x9   :  { %v2231_v14 = vld [vmem:[#allocation2 + $0x2d0] sm:$0xf]  ;;  %v2807_v15 = vld [vmem:[#allocation2 + $0x2d8] sm:$0xf0]  ;;  %1062 = vmatpush.bf16.msra.mxu1 %v2052_v7  ;;  %v2040_v16 = vor.u32 %v2759_v13, %v2039_v11  ;;  %v2786_v19 = vld [vmem:[#allocation2 + $0x230] sm:$0xf0] }
   0xa   :  { %1088 = vmatpush.bf16.msra.mxu3 %v2244_v8  ;;  %v2232_v17 = vor.u32 %v2807_v15, %v2231_v14  ;;  %v1931_v20 = vld [vmem:[#allocation2 + $0x78] sm:$0xf]  ;;  %v2148_v21 = vor.u32 %v2786_v19, %v2147_v18  ;;  %v2732_v22 = vld [vmem:[#allocation2 + $0x80] sm:$0xf0]  ;;  %v2135_v27 = vld [vmem:[#allocation2 + $0x210] sm:$0xf] }
   0xb   :  { %v2027_v23 = vld [vmem:[#allocation2 + $0x138] sm:$0xf]  ;;  %v2756_v24 = vld [vmem:[#allocation2 + $0x140] sm:$0xf0]  ;;  %v1932_v28 = vor.u32 %v2732_v22, %v1931_v20  ;;  %v2783_v29 = vld [vmem:[#allocation2 + $0x218] sm:$0xf0] }
   0xc   :  { %v2219_v25 = vld [vmem:[#allocation2 + $0x2b8] sm:$0xf]  ;;  %v2804_v26 = vld [vmem:[#allocation2 + $0x2c0] sm:$0xf0]  ;;  %1050 = vmatpush.bf16.msra.mxu0 %v1944_v12  ;;  %1075 = vmatpush.bf16.msra.mxu2 %v2148_v21  ;;  %v1919_v30 = vld [vmem:[#allocation2 + $0x60] sm:$0xf]  ;;  %v2028_v32 = vor.u32 %v2756_v24, %v2027_v23  ;;  %v2136_v34 = vor.u32 %v2783_v29, %v2135_v27 }
   0xd   :  { %v2729_v31 = vld [vmem:[#allocation2 + $0x68] sm:$0xf0]  ;;  %1063 = vmatpush.bf16.msra.mxu1 %v2040_v16  ;;  %v2220_v33 = vor.u32 %v2804_v26, %v2219_v25  ;;  %v2015_v35 = vld [vmem:[#allocation2 + $0x120] sm:$0xf]  ;;  %v2123_v39 = vld [vmem:[#allocation2 + $0x1f8] sm:$0xf] }
   0xe   :  { %1089 = vmatpush.bf16.msra.mxu3 %v2232_v17  ;;  %v2753_v36 = vld [vmem:[#allocation2 + $0x128] sm:$0xf0]  ;;  %v2207_v37 = vld [vmem:[#allocation2 + $0x2a0] sm:$0xf]  ;;  %v2780_v40 = vld [vmem:[#allocation2 + $0x200] sm:$0xf0]  ;;  %v1920_v41 = vor.u32 %v2729_v31, %v1919_v30 }
   0xf   :  { %v2801_v38 = vld [vmem:[#allocation2 + $0x2a8] sm:$0xf0]  ;;  %v2124_v42 = vor.u32 %v2780_v40, %v2123_v39  ;;  %v1907_v43 = vld [vmem:[#allocation2 + $0x48] sm:$0xf]  ;;  %v2726_v44 = vld [vmem:[#allocation2 + $0x50] sm:$0xf0]  ;;  %v2016_v45 = vor.u32 %v2753_v36, %v2015_v35 }
  0x10   :  { %1051 = vmatpush.bf16.msra.mxu0 %v1932_v28  ;;  %1076 = vmatpush.bf16.msra.mxu2 %v2136_v34  ;;  %v2208_v46 = vor.u32 %v2801_v38, %v2207_v37  ;;  %v2003_v47 = vld [vmem:[#allocation2 + $0x108] sm:$0xf]  ;;  %v2111_v48 = vld [vmem:[#allocation2 + $0x1e0] sm:$0xf]  ;;  %v2777_v49 = vld [vmem:[#allocation2 + $0x1e8] sm:$0xf0]  ;;  %v1908_v53 = vor.u32 %v2726_v44, %v1907_v43 }
  0x11   :  { %1064 = vmatpush.bf16.msra.mxu1 %v2028_v32  ;;  %v2750_v50 = vld [vmem:[#allocation2 + $0x110] sm:$0xf0]  ;;  %v2195_v51 = vld [vmem:[#allocation2 + $0x288] sm:$0xf]  ;;  %v2112_v54 = vor.u32 %v2777_v49, %v2111_v48  ;;  %v1895_v55 = vld [vmem:[#allocation2 + $0x30] sm:$0xf] }
  0x12   :  { %1090 = vmatpush.bf16.msra.mxu3 %v2220_v33  ;;  %v2798_v52 = vld [vmem:[#allocation2 + $0x290] sm:$0xf0]  ;;  %v2723_v56 = vld [vmem:[#allocation2 + $0x38] sm:$0xf0]  ;;  %v2004_v57 = vor.u32 %v2750_v50, %v2003_v47  ;;  %v1991_v59 = vld [vmem:[#allocation2 + $0xf0] sm:$0xf] }
  0x13   :  { %v2196_v58 = vor.u32 %v2798_v52, %v2195_v51  ;;  %v2099_v60 = vld [vmem:[#allocation2 + $0x1c8] sm:$0xf]  ;;  %v2774_v61 = vld [vmem:[#allocation2 + $0x1d0] sm:$0xf0]  ;;  %v2747_v62 = vld [vmem:[#allocation2 + $0xf8] sm:$0xf0]  ;;  %v1896_v1 = vor.u32 %v2723_v56, %v1895_v55 }
  0x14   :  { %1052 = vmatpush.bf16.msra.mxu0 %v1920_v41  ;;  %1077 = vmatpush.bf16.msra.mxu2 %v2124_v42  ;;  %v2183_v63 = vld [vmem:[#allocation2 + $0x270] sm:$0xf]  ;;  %v2795_v0 = vld [vmem:[#allocation2 + $0x278] sm:$0xf0]  ;;  %v2100_v2 = vor.u32 %v2774_v61, %v2099_v60  ;;  %v1883_v3 = vld [vmem:[#allocation2 + $0x18] sm:$0xf]  ;;  %v1992_v5 = vor.u32 %v2747_v62, %v1991_v59 }
  0x15   :  { %1065 = vmatpush.bf16.msra.mxu1 %v2016_v45  ;;  %v2720_v4 = vld [vmem:[#allocation2 + $0x20] sm:$0xf0]  ;;  %v2184_v6 = vor.u32 %v2795_v0, %v2183_v63  ;;  %v1979_v7 = vld [vmem:[#allocation2 + $0xd8] sm:$0xf]  ;;  %v2087_v8 = vld [vmem:[#allocation2 + $0x1b0] sm:$0xf] }
  0x16   :  { %1091 = vmatpush.bf16.msra.mxu3 %v2208_v46  ;;  %v2771_v9 = vld [vmem:[#allocation2 + $0x1b8] sm:$0xf0]  ;;  %v2744_v10 = vld [vmem:[#allocation2 + $0xe0] sm:$0xf0]  ;;  %v2171_v11 = vld [vmem:[#allocation2 + $0x258] sm:$0xf]  ;;  %v1884_v13 = vor.u32 %v2720_v4, %v1883_v3 }
  0x17   :  { %v2792_v12 = vld [vmem:[#allocation2 + $0x260] sm:$0xf0]  ;;  %v2088_v14 = vor.u32 %v2771_v9, %v2087_v8  ;;  %v1871_v15 = vld [vmem:[#allocation2] sm:$0xf]  ;;  %v2717_v16 = vld [vmem:[#allocation2 + $0x8] sm:$0xf0]  ;;  %v1980_v18 = vor.u32 %v2744_v10, %v1979_v7 }
  0x18   :  { %1053 = vmatpush.bf16.msra.mxu0 %v1908_v53  ;;  %1078 = vmatpush.bf16.msra.mxu2 %v2112_v54  ;;  %v1967_v17 = vld [vmem:[#allocation2 + $0xc0] sm:$0xf]  ;;  %v2172_v19 = vor.u32 %v2792_v12, %v2171_v11  ;;  %v2741_v20 = vld [vmem:[#allocation2 + $0xc8] sm:$0xf0]  ;;  %v2075_v21 = vld [vmem:[#allocation2 + $0x198] sm:$0xf]  ;;  %v1872_v29 = vor.u32 %v2717_v16, %v1871_v15 }
  0x19   :  { %1066 = vmatpush.bf16.msra.mxu1 %v2004_v57  ;;  %v2768_v22 = vld [vmem:[#allocation2 + $0x1a0] sm:$0xf0]  ;;  %v2159_v23 = vld [vmem:[#allocation2 + $0x240] sm:$0xf]  ;;  %v2789_v24 = vld [vmem:[#allocation2 + $0x248] sm:$0xf0]  ;;  %v1968_v33 = vor.u32 %v2741_v20, %v1967_v17 }
  0x1a   :  { %1092 = vmatpush.bf16.msra.mxu3 %v2196_v58  ;;  %v2339_v25 = vld [vmem:[#allocation2 + $0x3a8] sm:$0xf]  ;;  %v2834_v26 = vld [vmem:[#allocation2 + $0x3b0] sm:$0xf0]  ;;  %v2076_v30 = vor.u32 %v2768_v22, %v2075_v21  ;;  %v2737_v31 = vld [vmem:[#allocation2 + $0xac] sm:$0xf]  ;;  %v2160_v34 = vor.u32 %v2789_v24, %v2159_v23 }
  0x1b   :  { %v2435_v27 = vld [vmem:[#allocation2 + $0x468] sm:$0xf]  ;;  %v2858_v28 = vld [vmem:[#allocation2 + $0x470] sm:$0xf0]  ;;  %v1957_v32 = vld [vmem:[#allocation2 + $0xb4] sm:$0xf0]  ;;  %v2340_v38 = vor.u32 %v2834_v26, %v2339_v25 }
  0x1c   :  { %1054 = vmatpush.bf16.msra.mxu0 %v1896_v1  ;;  %1079 = vmatpush.bf16.msra.mxu2 %v2100_v2  ;;  %v2063_v35 = vld [vmem:[#allocation2 + $0x180] sm:$0xf]  ;;  %v2765_v36 = vld [vmem:[#allocation2 + $0x188] sm:$0xf0]  ;;  %v2327_v37 = vld [vmem:[#allocation2 + $0x390] sm:$0xf]  ;;  %v2436_v39 = vor.u32 %v2858_v28, %v2435_v27  ;;  %v1960_v43 = vor.u32 %v2737_v31, %v1957_v32 }
  0x1d   :  { %1067 = vmatpush.bf16.msra.mxu1 %v1992_v5  ;;  %v2831_v40 = vld [vmem:[#allocation2 + $0x398] sm:$0xf0]  ;;  %v2447_v41 = vld [vmem:[#allocation2 + $0x480] sm:$0xf]  ;;  %v2861_v42 = vld [vmem:[#allocation2 + $0x488] sm:$0xf0]  ;;  %v2064_v47 = vor.u32 %v2765_v36, %v2063_v35 }
  0x1e   :  { %1093 = vmatpush.bf16.msra.mxu3 %v2184_v6  ;;  %v2423_v44 = vld [vmem:[#allocation2 + $0x450] sm:$0xf]  ;;  %v2855_v45 = vld [vmem:[#allocation2 + $0x458] sm:$0xf0]  ;;  %v2734_v46 = vld [vmem:[#allocation2 + $0x94] sm:$0xf]  ;;  %v2448_v51 = vor.u32 %v2861_v42, %v2447_v41  ;;  %v2328_v55 = vor.u32 %v2831_v40, %v2327_v37 }
  0x1f   :  { %v1945_v48 = vld [vmem:[#allocation2 + $0x9c] sm:$0xf0]  ;;  %v45_v49 = vld [vmem:[%s3415_s0 + $0x10] sm:$0xff]  ;;  %v2761_v52 = vld [vmem:[#allocation2 + $0x16c] sm:$0xf]  ;;  %v2424_v56 = vor.u32 %v2855_v45, %v2423_v44  ;;  %vm1045_vm0 = vcmask 130048  }
  0x20   :  { %1055 = vmatpush.bf16.msra.mxu0 %v1884_v13  ;;  %1080 = vmatpush.bf16.msra.mxu2 %v2088_v14  ;;  %v43_v50 = vld [vmem:[%s3415_s0] sm:$0xff]  ;;  %v2053_v53 = vld [vmem:[#allocation2 + $0x174] sm:$0xf0]  ;;  %v1948_v59 = vor.u32 %v2734_v46, %v1945_v48  ;;  %v3011_v60 = vpack.c.bf16 %v45_v49, %v45_v49  ;;  %v44_v63 = vld [vmem:[%s3415_s0 + $0x8] sm:$0xff] }
  0x21   :  { %1068 = vmatpush.bf16.msra.mxu1 %v1980_v18  ;;  %v3009_v54 = vpack.c.bf16 %v43_v50, %v43_v50  ;;  %v2315_v57 = vld [vmem:[#allocation2 + $0x378] sm:$0xf]  ;;  %v2828_v58 = vld [vmem:[#allocation2 + $0x380] sm:$0xf0]  ;;  %v2731_v0 = vld [vmem:[#allocation2 + $0x7c] sm:$0xf]  ;;  %v2056_v2 = vor.u32 %v2761_v52, %v2053_v53  ;;  %v3017_v3 = vpack.c.bf16 %v44_v63, %v44_v63 }
  0x22   :  { %1094 = vmatpush.bf16.msra.mxu3 %v2172_v19  ;;  %v2411_v61 = vld [vmem:[#allocation2 + $0x438] sm:$0xf]  ;;  %v2852_v62 = vld [vmem:[#allocation2 + $0x440] sm:$0xf0]  ;;  %v1933_v1 = vld [vmem:[#allocation2 + $0x84] sm:$0xf0]  ;;  %v2316_v6 = vor.u32 %v2828_v58, %v2315_v57 }
  0x23   :  { %v2758_v4 = vld [vmem:[#allocation2 + $0x154] sm:$0xf]  ;;  %v2041_v5 = vld [vmem:[#allocation2 + $0x15c] sm:$0xf0]  ;;  %v2412_v7 = vor.u32 %v2852_v62, %v2411_v61  ;;  %v46_v9 = vld [vmem:[%s3415_s0 + $0x18] sm:$0xff]  ;;  %v1936_v10 = vor.u32 %v2731_v0, %v1933_v1 }
  0x24   :  { %1056 = vmatpush.bf16.msra.mxu0 %v1872_v29  ;;  %1081 = vmatpush.bf16.msra.mxu2 %v2076_v30  ;;  %v2303_v8 = vld [vmem:[#allocation2 + $0x360] sm:$0xf]  ;;  %v2825_v11 = vld [vmem:[#allocation2 + $0x368] sm:$0xf0]  ;;  %v3023_v14 = vpack.c.bf16 %v46_v9, %v46_v9  ;;  %v2728_v15 = vld [vmem:[#allocation2 + $0x64] sm:$0xf]  ;;  %v2044_v17 = vor.u32 %v2758_v4, %v2041_v5 }
  0x25   :  { %1069 = vmatpush.bf16.msra.mxu1 %v1968_v33  ;;  %v2399_v12 = vld [vmem:[#allocation2 + $0x420] sm:$0xf]  ;;  %v2849_v13 = vld [vmem:[#allocation2 + $0x428] sm:$0xf0]  ;;  %v1921_v16 = vld [vmem:[#allocation2 + $0x6c] sm:$0xf0]  ;;  %v2304_v20 = vor.u32 %v2825_v11, %v2303_v8 }
  0x26   :  { %1095 = vmatpush.bf16.msra.mxu3 %v2160_v34  ;;  %v2755_v18 = vld [vmem:[#allocation2 + $0x13c] sm:$0xf]  ;;  %v2029_v19 = vld [vmem:[#allocation2 + $0x144] sm:$0xf0]  ;;  %v2400_v21 = vor.u32 %v2849_v13, %v2399_v12  ;;  %v1924_v23 = vor.u32 %v2728_v15, %v1921_v16  ;;  %v2822_v24 = vld [vmem:[#allocation2 + $0x350] sm:$0xf0] }
  0x27   :  { %1057 = vmatmul.bf16.vlgmr.msra.gmra.mxu0 %v3009_v54  ;;  %v2291_v22 = vld [vmem:[#allocation2 + $0x348] sm:$0xf]  ;;  %v2846_v26 = vld [vmem:[#allocation2 + $0x410] sm:$0xf0]  ;;  %v2725_v27 = vld [vmem:[#allocation2 + $0x4c] sm:$0xf]  ;;  %v2032_v29 = vor.u32 %v2755_v18, %v2029_v19 }
  0x28   :  { %1101 = vmatpush.bf16.msrb.mxu0 %v2340_v38  ;;  %1082 = vmatpush.bf16.msra.mxu2 %v2064_v47  ;;  %v2387_v25 = vld [vmem:[#allocation2 + $0x408] sm:$0xf]  ;;  %v1909_v28 = vld [vmem:[#allocation2 + $0x54] sm:$0xf0]  ;;  %v2752_v30 = vld [vmem:[#allocation2 + $0x124] sm:$0xf]  ;;  %v2292_v32 = vor.u32 %v2822_v24, %v2291_v22 }
  0x29   :  { %1114 = vmatpush.bf16.msrb.mxu1 %v2436_v39  ;;  %1096 = vmatmul.bf16.vlgmr.msra.gmra.mxu3 %v3023_v14  ;;  %v2017_v31 = vld [vmem:[#allocation2 + $0x12c] sm:$0xf0]  ;;  %v2388_v33 = vor.u32 %v2846_v26, %v2387_v25  ;;  %v1912_v35 = vor.u32 %v2725_v27, %v1909_v28  ;;  %v2819_v36 = vld [vmem:[#allocation2 + $0x338] sm:$0xf0]  ;;  %v2722_v39 = vld [vmem:[#allocation2 + $0x34] sm:$0xf] }
  0x2a   :  { %1140 = vmatpush.bf16.msrb.mxu3 %v1960_v43  ;;  %1070 = vmatmul.bf16.vlgmr.msra.gmra.mxu1 %v3017_v3  ;;  %v2279_v34 = vld [vmem:[#allocation2 + $0x330] sm:$0xf]  ;;  %v2843_v38 = vld [vmem:[#allocation2 + $0x3f8] sm:$0xf0]  ;;  %v1897_v40 = vld [vmem:[#allocation2 + $0x3c] sm:$0xf0]  ;;  %v2020_v41 = vor.u32 %v2752_v30, %v2017_v31 }
  0x2b   :  { %1083 = vmatmul.bf16.vlgmr.msra.gmra.mxu2 %v3011_v60  ;;  %v2375_v37 = vld [vmem:[#allocation2 + $0x3f0] sm:$0xf]  ;;  %v2749_v43 = vld [vmem:[#allocation2 + $0x10c] sm:$0xf]  ;;  %v2005_v44 = vld [vmem:[#allocation2 + $0x114] sm:$0xf0]  ;;  %v2280_v45 = vor.u32 %v2819_v36, %v2279_v34  ;;  %v1900_v48 = vor.u32 %v2722_v39, %v1897_v40 }
  0x2c   :  { %1134 = vmatpush.bf16.msrb.mxu2 %v2448_v51  ;;  %1102 = vmatpush.bf16.msrb.mxu0 %v2328_v55  ;;  %v49_v42 = vld [vmem:[%s3415_s0 + $0x30] sm:$0xff]  ;;  %v2376_v46 = vor.u32 %v2843_v38, %v2375_v37  ;;  %v2267_v47 = vld [vmem:[#allocation2 + $0x318] sm:$0xf]  ;;  %v2816_v49 = vld [vmem:[#allocation2 + $0x320] sm:$0xf0] }
  0x2d   :  { %1115 = vmatpush.bf16.msrb.mxu1 %v2424_v56  ;;  %v2363_v50 = vld [vmem:[#allocation2 + $0x3d8] sm:$0xf]  ;;  %v2840_v51 = vld [vmem:[#allocation2 + $0x3e0] sm:$0xf0]  ;;  %v3030_v52 = vpack.c.bf16 %v49_v42, %v49_v42  ;;  %v2719_v53 = vld [vmem:[#allocation2 + $0x1c] sm:$0xf]  ;;  %v2008_v56 = vor.u32 %v2749_v43, %v2005_v44 }
  0x2e   :  { %1141 = vmatpush.bf16.msrb.mxu3 %v1948_v59  ;;  %v1885_v55 = vld [vmem:[#allocation2 + $0x24] sm:$0xf0]  ;;  %v2746_v57 = vld [vmem:[#allocation2 + $0xf4] sm:$0xf]  ;;  %v1993_v58 = vld [vmem:[#allocation2 + $0xfc] sm:$0xf0]  ;;  %v2268_v59 = vor.u32 %v2816_v49, %v2267_v47  ;;  %v2364_v61 = vor.u32 %v2840_v51, %v2363_v50 }
  0x2f   :  { %v2255_v62 = vld [vmem:[#allocation2 + $0x300] sm:$0xf]  ;;  %v2813_v63 = vld [vmem:[#allocation2 + $0x308] sm:$0xf0]  ;;  %v1888_v1 = vor.u32 %v2719_v53, %v1885_v55  ;;  %v2716_v4 = vld [vmem:[#allocation2 + $0x4] sm:$0xf] }
  0x30   :  { %1153 = vmatpush.bf16.msra.mxu2 %v2056_v2  ;;  %1103 = vmatpush.bf16.msrb.mxu0 %v2316_v6  ;;  %v2351_v0 = vld [vmem:[#allocation2 + $0x3c0] sm:$0xf]  ;;  %v2837_v2 = vld [vmem:[#allocation2 + $0x3c8] sm:$0xf0]  ;;  %v1873_v5 = vld [vmem:[#allocation2 + $0xc] sm:$0xf0]  ;;  %v1996_v6 = vor.u32 %v2746_v57, %v1993_v58  ;;  %v2256_v13 = vor.u32 %v2813_v63, %v2255_v62 }
  0x31   :  { %1116 = vmatpush.bf16.msrb.mxu1 %v2412_v7  ;;  %v2785_v7 = vld [vmem:[#allocation2 + $0x22c] sm:$0xf]  ;;  %v2149_v8 = vld [vmem:[#allocation2 + $0x234] sm:$0xf0]  ;;  %v2352_v15 = vor.u32 %v2837_v2, %v2351_v0  ;;  %v47_v16 = vld [vmem:[%s3415_s0 + $0x20] sm:$0xff]  ;;  %v1876_v19 = vor.u32 %v2716_v4, %v1873_v5 }
  0x32   :  { %1142 = vmatpush.bf16.msrb.mxu3 %v1936_v10  ;;  %v2809_v9 = vld [vmem:[#allocation2 + $0x2ec] sm:$0xf]  ;;  %v2245_v10 = vld [vmem:[#allocation2 + $0x2f4] sm:$0xf0]  ;;  %v1981_v18 = vld [vmem:[#allocation2 + $0xe4] sm:$0xf0]  ;;  %v3040_v27 = vpack.c.bf16 %v47_v16, %v47_v16 }
  0x33   :  { %v2833_v11 = vld [vmem:[#allocation2 + $0x3ac] sm:$0xf]  ;;  %v2341_v12 = vld [vmem:[#allocation2 + $0x3b4] sm:$0xf0]  ;;  %v2248_v22 = vor.u32 %v2809_v9, %v2245_v10  ;;  %v2782_v24 = vld [vmem:[#allocation2 + $0x214] sm:$0xf] }
  0x34   :  { %1154 = vmatpush.bf16.msra.mxu2 %v2044_v17  ;;  %1104 = vmatpush.bf16.msrb.mxu0 %v2304_v20  ;;  %v2743_v17 = vld [vmem:[#allocation2 + $0xdc] sm:$0xf]  ;;  %v2152_v20 = vor.u32 %v2785_v7, %v2149_v8  ;;  %v2137_v25 = vld [vmem:[#allocation2 + $0x21c] sm:$0xf0]  ;;  %v2806_v26 = vld [vmem:[#allocation2 + $0x2d4] sm:$0xf] }
  0x35   :  { %1117 = vmatpush.bf16.msrb.mxu1 %v2400_v21  ;;  %v48_v21 = vld [vmem:[%s3415_s0 + $0x28] sm:$0xff]  ;;  %v1984_v28 = vor.u32 %v2743_v17, %v1981_v18  ;;  %v2830_v30 = vld [vmem:[#allocation2 + $0x394] sm:$0xf]  ;;  %v2329_v31 = vld [vmem:[#allocation2 + $0x39c] sm:$0xf0] }
  0x36   :  { %1143 = vmatpush.bf16.msrb.mxu3 %v1924_v23  ;;  %v2344_v23 = vor.u32 %v2833_v11, %v2341_v12  ;;  %v1969_v34 = vld [vmem:[#allocation2 + $0xcc] sm:$0xf0]  ;;  %v2857_v36 = vld [vmem:[#allocation2 + $0x46c] sm:$0xf]  ;;  %v2437_v37 = vld [vmem:[#allocation2 + $0x474] sm:$0xf0]  ;;  %v2332_v39 = vor.u32 %v2830_v30, %v2329_v31 }
  0x37   :  { %v2779_v40 = vld [vmem:[#allocation2 + $0x1fc] sm:$0xf]  ;;  %v2221_v44 = vld [vmem:[#allocation2 + $0x2c4] sm:$0xf0]  ;;  %v2440_v47 = vor.u32 %v2857_v36, %v2437_v37  ;;  %v2854_v49 = vld [vmem:[#allocation2 + $0x454] sm:$0xf] }
  0x38   :  { %1155 = vmatpush.bf16.msra.mxu2 %v2032_v29  ;;  %1105 = vmatpush.bf16.msrb.mxu0 %v2292_v32  ;;  %v2233_v29 = vld [vmem:[#allocation2 + $0x2dc] sm:$0xf0]  ;;  %v3042_v32 = vpack.c.bf16 %v48_v21, %v48_v21  ;;  %v2803_v42 = vld [vmem:[#allocation2 + $0x2bc] sm:$0xf]  ;;  %v2776_v55 = vld [vmem:[#allocation2 + $0x1e4] sm:$0xf] }
  0x39   :  { %1118 = vmatpush.bf16.msrb.mxu1 %v2388_v33  ;;  %v2740_v33 = vld [vmem:[#allocation2 + $0xc4] sm:$0xf]  ;;  %v2236_v38 = vor.u32 %v2806_v26, %v2233_v29  ;;  %v2425_v50 = vld [vmem:[#allocation2 + $0x45c] sm:$0xf0]  ;;  %v2224_v51 = vor.u32 %v2803_v42, %v2221_v44  ;;  %v2209_v58 = vld [vmem:[#allocation2 + $0x2ac] sm:$0xf0] }
  0x3a   :  { %1144 = vmatpush.bf16.msrb.mxu3 %v1912_v35  ;;  %v2140_v35 = vor.u32 %v2782_v24, %v2137_v25  ;;  %v1972_v43 = vor.u32 %v2740_v33, %v1969_v34  ;;  %v2800_v57 = vld [vmem:[#allocation2 + $0x2a4] sm:$0xf]  ;;  %v2428_v62 = vor.u32 %v2854_v49, %v2425_v50  ;;  %v2851_v0 = vld [vmem:[#allocation2 + $0x43c] sm:$0xf]  ;;  %v2773_v5 = vld [vmem:[#allocation2 + $0x1cc] sm:$0xf] }
  0x3b   :  { %2457 = vmatmul.msk.bf16.vlgmr.msrb.gmra.mxu2 %vm1045_vm0, %v3030_v52  ;;  %v2212_v2 = vor.u32 %v2800_v57, %v2209_v58  ;;  %v2797_v7 = vld [vmem:[#allocation2 + $0x28c] sm:$0xf]  ;;  %v2197_v8 = vld [vmem:[#allocation2 + $0x294] sm:$0xf0]  ;;  %v2401_v16 = vld [vmem:[#allocation2 + $0x42c] sm:$0xf0] }
  0x3c   :  { %1156 = vmatpush.bf16.msra.mxu2 %v2020_v41  ;;  %1106 = vmatpush.bf16.msrb.mxu0 %v2280_v45  ;;  %v2125_v41 = vld [vmem:[#allocation2 + $0x204] sm:$0xf0]  ;;  %v2827_v45 = vld [vmem:[#allocation2 + $0x37c] sm:$0xf]  ;;  %v2821_v9 = vld [vmem:[#allocation2 + $0x34c] sm:$0xf]  ;;  %v2200_v17 = vor.u32 %v2797_v7, %v2197_v8 }
  0x3d   :  { %1119 = vmatpush.bf16.msrb.mxu1 %v2376_v46  ;;  %v2317_v46 = vld [vmem:[#allocation2 + $0x384] sm:$0xf0]  ;;  %v2293_v10 = vld [vmem:[#allocation2 + $0x354] sm:$0xf0]  ;;  %v2185_v21 = vld [vmem:[#allocation2 + $0x27c] sm:$0xf0] }
  0x3e   :  { %1145 = vmatpush.bf16.msrb.mxu3 %v1900_v48  ;;  %v2128_v48 = vor.u32 %v2779_v40, %v2125_v41  ;;  %v2320_v53 = vor.u32 %v2827_v45, %v2317_v46  ;;  %v2296_v18 = vor.u32 %v2821_v9, %v2293_v10  ;;  %v2845_v26 = vld [vmem:[#allocation2 + $0x40c] sm:$0xf]  ;;  %v2767_v31 = vld [vmem:[#allocation2 + $0x19c] sm:$0xf]  ;;  %v2077_v33 = vld [vmem:[#allocation2 + $0x1a4] sm:$0xf0] }
  0x3f   :  { %v2791_v34 = vld [vmem:[#allocation2 + $0x25c] sm:$0xf]  ;;  %v2269_v37 = vld [vmem:[#allocation2 + $0x324] sm:$0xf0]  ;;  %v2764_v40 = vld [vmem:[#allocation2 + $0x184] sm:$0xf] }
  0x40   :  { %1157 = vmatpush.bf16.msra.mxu2 %v2008_v56  ;;  %1107 = vmatpush.bf16.msrb.mxu0 %v2268_v59  ;;  %v2113_v56 = vld [vmem:[#allocation2 + $0x1ec] sm:$0xf0]  ;;  %v2824_v59 = vld [vmem:[#allocation2 + $0x364] sm:$0xf]  ;;  %v2815_v36 = vld [vmem:[#allocation2 + $0x31c] sm:$0xf] }
  0x41   :  { %1120 = vmatpush.bf16.msrb.mxu1 %v2364_v61  ;;  %v2305_v61 = vld [vmem:[#allocation2 + $0x36c] sm:$0xf0]  ;;  %v2116_v63 = vor.u32 %v2776_v55, %v2113_v56  ;;  %v2842_v41 = vld [vmem:[#allocation2 + $0x3f4] sm:$0xf]  ;;  %v2377_v42 = vld [vmem:[#allocation2 + $0x3fc] sm:$0xf0]  ;;  %v2272_v44 = vor.u32 %v2815_v36, %v2269_v37 }
  0x42   :  { %1146 = vmatpush.bf16.msrb.mxu3 %v1888_v1  ;;  %v2413_v1 = vld [vmem:[#allocation2 + $0x444] sm:$0xf0]  ;;  %v2308_v4 = vor.u32 %v2824_v59, %v2305_v61  ;;  %v2065_v45 = vld [vmem:[#allocation2 + $0x18c] sm:$0xf0]  ;;  %v2788_v46 = vld [vmem:[#allocation2 + $0x244] sm:$0xf] }
  0x43   :  { %v2416_v11 = vor.u32 %v2851_v0, %v2413_v1  ;;  %v2257_v49 = vld [vmem:[#allocation2 + $0x30c] sm:$0xf0]  ;;  %v2763_v56 = vld [vmem:[#allocation2 + $0x178] sm:$0xf0]  ;;  %v2068_v57 = vor.u32 %v2764_v40, %v2065_v45  ;;  %v2365_v59 = vld [vmem:[#allocation2 + $0x3e4] sm:$0xf0] }
  0x44   :  { %1158 = vmatpush.bf16.msra.mxu2 %v1996_v6  ;;  %1108 = vmatpush.bf16.msrb.mxu0 %v2256_v13  ;;  %v2101_v6 = vld [vmem:[#allocation2 + $0x1d4] sm:$0xf0]  ;;  %v2770_v13 = vld [vmem:[#allocation2 + $0x1b4] sm:$0xf]  ;;  %v1963_v50 = vld [vmem:[#allocation2 + $0xb0] sm:$0xf] }
  0x45   :  { %1121 = vmatpush.bf16.msrb.mxu1 %v2352_v15  ;;  %v2104_v12 = vor.u32 %v2773_v5, %v2101_v6  ;;  %v2848_v15 = vld [vmem:[#allocation2 + $0x424] sm:$0xf]  ;;  %v2059_v55 = vld [vmem:[#allocation2 + $0x170] sm:$0xf]  ;;  %v2839_v58 = vld [vmem:[#allocation2 + $0x3dc] sm:$0xf] }
  0x46   :  { %1147 = vmatpush.bf16.msrb.mxu3 %v1876_v19  ;;  %v2089_v19 = vld [vmem:[#allocation2 + $0x1bc] sm:$0xf0]  ;;  %v2404_v24 = vor.u32 %v2848_v15, %v2401_v16  ;;  %v2060_v1 = vor.u32 %v2763_v56, %v2059_v55  ;;  %v2449_v5 = vld [vmem:[#allocation2 + $0x48c] sm:$0xf0]  ;;  %v2368_v6 = vor.u32 %v2839_v58, %v2365_v59  ;;  %v2047_v7 = vld [vmem:[#allocation2 + $0x158] sm:$0xf] }
  0x47   :  { %1109 = vmatmul.bf16.vlgmr.msrb.gmra.mxu0 %v3040_v27  ;;  %v2092_v25 = vor.u32 %v2770_v13, %v2089_v19  ;;  %v2760_v8 = vld [vmem:[#allocation2 + $0x160] sm:$0xf0]  ;;  %v2353_v10 = vld [vmem:[#allocation2 + $0x3cc] sm:$0xf0]  ;;  %v2811_v16 = vld [vmem:[#allocation2 + $0x2f8] sm:$0xf0] }
  0x48   :  { %1166 = vmatpush.bf16.msra.mxu0 %v2152_v20  ;;  %1159 = vmatpush.bf16.msra.mxu2 %v1984_v28  ;;  %v2794_v20 = vld [vmem:[#allocation2 + $0x274] sm:$0xf]  ;;  %v2389_v28 = vld [vmem:[#allocation2 + $0x414] sm:$0xf0]  ;;  %v2836_v9 = vld [vmem:[#allocation2 + $0x3c4] sm:$0xf] }
  0x49   :  { %1179 = vmatpush.bf16.msra.mxu1 %v2248_v22  ;;  %1148 = vmatmul.bf16.vlgmr.msrb.gmra.mxu3 %v3009_v54  ;;  %v2818_v22 = vld [vmem:[#allocation2 + $0x334] sm:$0xf]  ;;  %v2188_v29 = vor.u32 %v2794_v20, %v2185_v21  ;;  %v2251_v15 = vld [vmem:[#allocation2 + $0x2f0] sm:$0xf]  ;;  %v1939_v19 = vld [vmem:[#allocation2 + $0x80] sm:$0xf]  ;;  %v2356_v20 = vor.u32 %v2836_v9, %v2353_v10 }
  0x4a   :  { %1192 = vmatpush.bf16.msra.mxu3 %v2344_v23  ;;  %1122 = vmatmul.bf16.vlgmr.msrb.gmra.mxu1 %v3042_v32  ;;  %v2281_v23 = vld [vmem:[#allocation2 + $0x33c] sm:$0xf0]  ;;  %v2733_v21 = vld [vmem:[#allocation2 + $0x88] sm:$0xf0]  ;;  %v2023_v36 = vld [vmem:[#allocation2 + $0x128] sm:$0xf] }
  0x4b   :  { %v2284_v30 = vor.u32 %v2818_v22, %v2281_v23  ;;  %v2035_v22 = vld [vmem:[#allocation2 + $0x140] sm:$0xf]  ;;  %v2757_v23 = vld [vmem:[#allocation2 + $0x148] sm:$0xf0]  ;;  %v2754_v37 = vld [vmem:[#allocation2 + $0x130] sm:$0xf0] }
  0x4c   :  { %1167 = vmatpush.bf16.msra.mxu0 %v2140_v35  ;;  %1160 = vmatpush.bf16.msra.mxu2 %v1972_v43  ;;  %v2173_v35 = vld [vmem:[#allocation2 + $0x264] sm:$0xf0]  ;;  %v2781_v40 = vld [vmem:[#allocation2 + $0x208] sm:$0xf0]  ;;  %v2024_v45 = vor.u32 %v2754_v37, %v2023_v36  ;;  %v2778_v55 = vld [vmem:[#allocation2 + $0x1f0] sm:$0xf0] }
  0x4d   :  { %1180 = vmatpush.bf16.msra.mxu1 %v2236_v38  ;;  %v2392_v38 = vor.u32 %v2845_v26, %v2389_v28  ;;  %v2176_v43 = vor.u32 %v2791_v34, %v2173_v35  ;;  %v2784_v26 = vld [vmem:[#allocation2 + $0x220] sm:$0xf0]  ;;  %v2252_v28 = vor.u32 %v2811_v16, %v2251_v15  ;;  %v1927_v34 = vld [vmem:[#allocation2 + $0x68] sm:$0xf]  ;;  %v2730_v35 = vld [vmem:[#allocation2 + $0x70] sm:$0xf0] }
  0x4e   :  { %1193 = vmatpush.bf16.msra.mxu3 %v2332_v39  ;;  %v2080_v39 = vor.u32 %v2767_v31, %v2077_v33  ;;  %v1940_v31 = vor.u32 %v2733_v21, %v1939_v19  ;;  %v2036_v33 = vor.u32 %v2757_v23, %v2035_v22  ;;  %v2215_v56 = vld [vmem:[#allocation2 + $0x2a8] sm:$0xf]  ;;  %v1891_v10 = vld [vmem:[#allocation2 + $0x20] sm:$0xf]  ;;  %v2095_v16 = vld [vmem:[#allocation2 + $0x1b8] sm:$0xf] }
  0x4f   :  { %1161 = vmatmul.bf16.vlgmr.msra.gmra.mxu2 %v3017_v3  ;;  %v2191_v19 = vld [vmem:[#allocation2 + $0x278] sm:$0xf]  ;;  %v1879_v23 = vld [vmem:[#allocation2 + $0x8] sm:$0xf]  ;;  %v2769_v36 = vld [vmem:[#allocation2 + $0x1a8] sm:$0xf0] }
  0x50   :  { %1205 = vmatpush.bf16.msrb.mxu2 %v2440_v47  ;;  %1168 = vmatpush.bf16.msra.mxu0 %v2128_v48  ;;  %v2161_v47 = vld [vmem:[#allocation2 + $0x24c] sm:$0xf0]  ;;  %v2812_v48 = vld [vmem:[#allocation2 + $0x304] sm:$0xf]  ;;  %v2179_v37 = vld [vmem:[#allocation2 + $0x260] sm:$0xf] }
  0x51   :  { %1181 = vmatpush.bf16.msra.mxu1 %v2224_v51  ;;  %v2380_v51 = vor.u32 %v2842_v41, %v2377_v42  ;;  %v2164_v61 = vor.u32 %v2788_v46, %v2161_v47  ;;  %v2227_v42 = vld [vmem:[#allocation2 + $0x2c0] sm:$0xf]  ;;  %v1915_v46 = vld [vmem:[#allocation2 + $0x50] sm:$0xf]  ;;  %v2727_v47 = vld [vmem:[#allocation2 + $0x58] sm:$0xf0] }
  0x52   :  { %1194 = vmatpush.bf16.msra.mxu3 %v2320_v53  ;;  %v2739_v53 = vld [vmem:[#allocation2 + $0xb8] sm:$0xf0]  ;;  %v1916_v58 = vor.u32 %v2727_v47, %v1915_v46  ;;  %v2856_v46 = vld [vmem:[#allocation2 + $0x460] sm:$0xf0] }
  0x53   :  { %v1964_v0 = vor.u32 %v2739_v53, %v1963_v50 }
  0x54   :  { %1206 = vmatpush.bf16.msrb.mxu2 %v2428_v62  ;;  %1169 = vmatpush.bf16.msra.mxu0 %v2116_v63  ;;  %v2260_v62 = vor.u32 %v2812_v48, %v2257_v49  ;;  %v1951_v63 = vld [vmem:[#allocation2 + $0x98] sm:$0xf]  ;;  %v2011_v48 = vld [vmem:[#allocation2 + $0x110] sm:$0xf]  ;;  %v2751_v49 = vld [vmem:[#allocation2 + $0x118] sm:$0xf0] }
  0x55   :  { %1182 = vmatpush.bf16.msra.mxu1 %v2212_v2  ;;  %v2736_v2 = vld [vmem:[#allocation2 + $0xa0] sm:$0xf0]  ;;  %v2012_v59 = vor.u32 %v2751_v49, %v2011_v48  ;;  %v2071_v48 = vld [vmem:[#allocation2 + $0x188] sm:$0xf]  ;;  %v2766_v49 = vld [vmem:[#allocation2 + $0x190] sm:$0xf0] }
  0x56   :  { %1195 = vmatpush.bf16.msra.mxu3 %v2308_v4  ;;  %v2860_v4 = vld [vmem:[#allocation2 + $0x484] sm:$0xf] }
  0x57   :  { %v2452_v13 = vor.u32 %v2860_v4, %v2449_v5  ;;  %v2775_v5 = vld [vmem:[#allocation2 + $0x1d8] sm:$0xf0] }
  0x58   :  { %1207 = vmatpush.bf16.msrb.mxu2 %v2416_v11  ;;  %1170 = vmatpush.bf16.msra.mxu0 %v2104_v12  ;;  %v2155_v11 = vld [vmem:[#allocation2 + $0x230] sm:$0xf]  ;;  %v2787_v12 = vld [vmem:[#allocation2 + $0x238] sm:$0xf0] }
  0x59   :  { %1183 = vmatpush.bf16.msra.mxu1 %v2200_v17  ;;  %v1952_v17 = vor.u32 %v2736_v2, %v1951_v63  ;;  %v1999_v63 = vld [vmem:[#allocation2 + $0xf8] sm:$0xf]  ;;  %v2107_v2 = vld [vmem:[#allocation2 + $0x1d0] sm:$0xf] }
  0x5a   :  { %1196 = vmatpush.bf16.msra.mxu3 %v2296_v18  ;;  %v2048_v18 = vor.u32 %v2760_v8, %v2047_v7  ;;  %v2799_v7 = vld [vmem:[#allocation2 + $0x298] sm:$0xf0]  ;;  %v2108_v15 = vor.u32 %v2775_v5, %v2107_v2  ;;  %v2072_v2 = vor.u32 %v2766_v49, %v2071_v48  ;;  %v2486_v49 = vld [vmem:[%s3418_s3 + $0x30] sm:$0xf] }
  0x5c   :  { %1208 = vmatpush.bf16.msrb.mxu2 %v2404_v24  ;;  %1171 = vmatpush.bf16.msra.mxu0 %v2092_v25  ;;  %v2156_v24 = vor.u32 %v2787_v12, %v2155_v11  ;;  %v2143_v25 = vld [vmem:[#allocation2 + $0x218] sm:$0xf]  ;;  %v2721_v11 = vld [vmem:[#allocation2 + $0x28] sm:$0xf0]  ;;  %v1987_v12 = vld [vmem:[#allocation2 + $0xe0] sm:$0xf] }
  0x5d   :  { %1184 = vmatpush.bf16.msra.mxu1 %v2188_v29  ;;  %v2239_v29 = vld [vmem:[#allocation2 + $0x2d8] sm:$0xf]  ;;  %v1892_v21 = vor.u32 %v2721_v11, %v1891_v10  ;;  %v2826_v10 = vld [vmem:[#allocation2 + $0x370] sm:$0xf0]  ;;  %v2407_v11 = vld [vmem:[#allocation2 + $0x428] sm:$0xf] }
  0x5e   :  { %1197 = vmatpush.bf16.msra.mxu3 %v2284_v30  ;;  %v2808_v30 = vld [vmem:[#allocation2 + $0x2e0] sm:$0xf0] }
  0x5f   :  { %v2240_v41 = vor.u32 %v2808_v30, %v2239_v29  ;;  %v2835_v29 = vld [vmem:[#allocation2 + $0x3b8] sm:$0xf0]  ;;  %v2443_v30 = vld [vmem:[#allocation2 + $0x470] sm:$0xf] }
  0x60   :  { %1209 = vmatpush.bf16.msrb.mxu2 %v2392_v38  ;;  %1172 = vmatpush.bf16.msra.mxu0 %v2080_v39  ;;  %v2144_v38 = vor.u32 %v2784_v26, %v2143_v25  ;;  %v2131_v39 = vld [vmem:[#allocation2 + $0x200] sm:$0xf]  ;;  %v1975_v25 = vld [vmem:[#allocation2 + $0xc8] sm:$0xf]  ;;  %v2742_v26 = vld [vmem:[#allocation2 + $0xd0] sm:$0xf0] }
  0x61   :  { %1185 = vmatpush.bf16.msra.mxu1 %v2176_v43  ;;  %v2805_v43 = vld [vmem:[#allocation2 + $0x2c8] sm:$0xf0]  ;;  %v2132_v50 = vor.u32 %v2781_v40, %v2131_v39  ;;  %v1976_v40 = vor.u32 %v2742_v26, %v1975_v25  ;;  %v2383_v25 = vld [vmem:[#allocation2 + $0x3f8] sm:$0xf]  ;;  %v2844_v26 = vld [vmem:[#allocation2 + $0x400] sm:$0xf0] }
  0x62   :  { %1198 = vmatpush.bf16.msra.mxu3 %v2272_v44  ;;  %v1928_v44 = vor.u32 %v2730_v35, %v1927_v34  ;;  %v2228_v53 = vor.u32 %v2805_v43, %v2227_v42  ;;  %v2083_v34 = vld [vmem:[#allocation2 + $0x1a0] sm:$0xf]  ;;  %v2335_v43 = vld [vmem:[#allocation2 + $0x398] sm:$0xf] }
  0x63   :  { %v2084_v47 = vor.u32 %v2769_v36, %v2083_v34  ;;  %v2874_v34 = vld [vmem:[%s3418_s3 + $0x54] sm:$0xf0]  ;;  %v2494_v36 = vld [vmem:[%s3418_s3 + $0x40] sm:$0xf] }
  0x64   :  { %1210 = vmatpush.bf16.msrb.mxu2 %v2380_v51  ;;  %1173 = vmatpush.bf16.msra.mxu0 %v2068_v57  ;;  %v2119_v51 = vld [vmem:[#allocation2 + $0x1e8] sm:$0xf]  ;;  %v2802_v57 = vld [vmem:[#allocation2 + $0x2b0] sm:$0xf0] }
  0x65   :  { %1186 = vmatpush.bf16.msra.mxu1 %v2164_v61  ;;  %v1903_v61 = vld [vmem:[#allocation2 + $0x38] sm:$0xf]  ;;  %v2216_v4 = vor.u32 %v2802_v57, %v2215_v56  ;;  %v2862_v56 = vld [vmem:[#allocation2 + $0x490] sm:$0xf0]  ;;  %v2518_v57 = vld [vmem:[%s3418_s3 + $0x70] sm:$0xf] }
  0x66   :  { %1199 = vmatpush.bf16.msra.mxu3 %v2260_v62  ;;  %v2724_v62 = vld [vmem:[#allocation2 + $0x40] sm:$0xf0] }
  0x67   :  { %1174 = vmatmul.bf16.vlgmr.msra.gmra.mxu0 %v3011_v60  ;;  %v1904_v8 = vor.u32 %v2724_v62, %v1903_v61  ;;  %v2323_v62 = vld [vmem:[#allocation2 + $0x380] sm:$0xf] }
  0x68   :  { %1211 = vmatpush.bf16.msrb.mxu2 %v2368_v6  ;;  %1187 = vmatmul.bf16.vlgmr.msra.gmra.mxu1 %v3023_v14  ;;  %v2203_v6 = vld [vmem:[#allocation2 + $0x290] sm:$0xf] }
  0x69   :  { %1231 = vmatpush.bf16.msrb.mxu1 %v1964_v0  ;;  %1200 = vmatmul.bf16.vlgmr.msra.gmra.mxu3 %v3040_v27  ;;  %v2748_v0 = vld [vmem:[#allocation2 + $0x100] sm:$0xf0] }
  0x6a   :  { %1244 = vmatpush.bf16.msrb.mxu3 %v2060_v1  ;;  %1225 = vmatpush.bf16.msrb.mxu0 %v2452_v13  ;;  %v2120_v1 = vor.u32 %v2778_v55, %v2119_v51  ;;  %v2000_v9 = vor.u32 %v2748_v0, %v1999_v63  ;;  %v2745_v13 = vld [vmem:[#allocation2 + $0xe8] sm:$0xf0]  ;;  %v2167_v51 = vld [vmem:[#allocation2 + $0x248] sm:$0xf]  ;;  %v2419_v0 = vld [vmem:[#allocation2 + $0x440] sm:$0xf] }
  0x6b   :  { %v1988_v22 = vor.u32 %v2745_v13, %v1987_v12  ;;  %v2455_v55 = vld [vmem:[#allocation2 + $0x488] sm:$0xf]  ;;  %v2829_v63 = vld [vmem:[#allocation2 + $0x388] sm:$0xf0]  ;;  %v2850_v12 = vld [vmem:[#allocation2 + $0x430] sm:$0xf0] }
  0x6c   :  { %1212 = vmatpush.bf16.msrb.mxu2 %v2356_v20  ;;  %v2796_v20 = vld [vmem:[#allocation2 + $0x280] sm:$0xf0]  ;;  %v2456_v5 = vor.u32 %v2862_v56, %v2455_v55  ;;  %v2512_v56 = vld [vmem:[%s3418_s3 + $0x68] sm:$0xf0] }
  0x6d   :  { %1232 = vmatpush.bf16.msrb.mxu1 %v1952_v17  ;;  %v2204_v17 = vor.u32 %v2799_v7, %v2203_v6  ;;  %v2192_v35 = vor.u32 %v2796_v20, %v2191_v19  ;;  %v2324_v7 = vor.u32 %v2829_v63, %v2323_v62  ;;  %v2395_v19 = vld [vmem:[#allocation2 + $0x410] sm:$0xf]  ;;  %v2847_v20 = vld [vmem:[#allocation2 + $0x418] sm:$0xf0]  ;;  %v2875_v55 = vld [vmem:[%s3418_s3 + $0x64] sm:$0xf] }
  0x6e   :  { %1245 = vmatpush.bf16.msrb.mxu3 %v2048_v18  ;;  %1257 = vmatpush.bf16.msra.mxu0 %v2156_v24  ;;  %v2772_v18 = vld [vmem:[#allocation2 + $0x1c0] sm:$0xf0]  ;;  %v2718_v24 = vld [vmem:[#allocation2 + $0x10] sm:$0xf0]  ;;  %v2496_v62 = vld [vmem:[%s3418_s3 + $0x48] sm:$0xf0] }
  0x6f   :  { %1213 = vmatmul.bf16.vlgmr.msrb.gmra.mxu2 %v3042_v32  ;;  %v1880_v39 = vor.u32 %v2718_v24, %v1879_v23  ;;  %v2287_v23 = vld [vmem:[#allocation2 + $0x338] sm:$0xf]  ;;  %v2820_v24 = vld [vmem:[#allocation2 + $0x340] sm:$0xf0]  ;;  %v2478_v63 = vld [vmem:[%s3418_s3 + $0x20] sm:$0xf] }
  0x70   :  { %1270 = vmatpush.bf16.msra.mxu2 %v2252_v28  ;;  %v2347_v28 = vld [vmem:[#allocation2 + $0x3b0] sm:$0xf] }
  0x71   :  { %1233 = vmatpush.bf16.msrb.mxu1 %v1940_v31  ;;  %v2859_v31 = vld [vmem:[#allocation2 + $0x478] sm:$0xf0] }
  0x72   :  { %1246 = vmatpush.bf16.msrb.mxu3 %v2036_v33  ;;  %1258 = vmatpush.bf16.msra.mxu0 %v2144_v38  ;;  %v2096_v33 = vor.u32 %v2772_v18, %v2095_v16  ;;  %v2793_v38 = vld [vmem:[#allocation2 + $0x268] sm:$0xf0]  ;;  %v2444_v42 = vor.u32 %v2859_v31, %v2443_v30  ;;  %v2299_v16 = vld [vmem:[#allocation2 + $0x350] sm:$0xf]  ;;  %v2823_v18 = vld [vmem:[#allocation2 + $0x358] sm:$0xf0] }
  0x73   :  { %v2275_v30 = vld [vmem:[#allocation2 + $0x320] sm:$0xf] }
  0x74   :  { %1271 = vmatpush.bf16.msra.mxu2 %v2240_v41  ;;  %v2348_v41 = vor.u32 %v2835_v29, %v2347_v28  ;;  %v2288_v28 = vor.u32 %v2820_v24, %v2287_v23  ;;  %v2384_v29 = vor.u32 %v2844_v26, %v2383_v25  ;;  %v2371_v31 = vld [vmem:[#allocation2 + $0x3e0] sm:$0xf]  ;;  %v2584_v25 = vld [vmem:[%s3418_s3 + $0xf8] sm:$0xf0] }
  0x75   :  { %1234 = vmatpush.bf16.msrb.mxu1 %v1928_v44  ;;  %v2832_v44 = vld [vmem:[#allocation2 + $0x3a0] sm:$0xf0]  ;;  %v2574_v26 = vld [vmem:[%s3418_s3 + $0xe0] sm:$0xf] }
  0x76   :  { %1247 = vmatpush.bf16.msrb.mxu3 %v2024_v45  ;;  %1259 = vmatpush.bf16.msra.mxu0 %v2132_v50  ;;  %v2431_v45 = vld [vmem:[#allocation2 + $0x458] sm:$0xf]  ;;  %v2180_v50 = vor.u32 %v2793_v38, %v2179_v37  ;;  %v2872_v37 = vld [vmem:[%s3418_s3 + $0x44] sm:$0xf0] }
  0x77   :  { %2458 = vmatmul.msk.bf16.vlgmr.msrb.gmra.mxu0 %vm1045_vm0, %v3030_v52  ;;  %v2432_v61 = vor.u32 %v2856_v46, %v2431_v45  ;;  %v2877_v45 = vld [vmem:[%s3418_s3 + $0x74] sm:$0xf]  ;;  %v2520_v46 = vld [vmem:[%s3418_s3 + $0x78] sm:$0xf0] }
  0x78   :  { %1272 = vmatpush.bf16.msra.mxu2 %v2228_v53  ;;  %v2790_v53 = vld [vmem:[#allocation2 + $0x250] sm:$0xf0] }
  0x79   :  { %1235 = vmatpush.bf16.msrb.mxu1 %v1916_v58  ;;  %v2878_v58 = vld [vmem:[%s3418_s3 + $0x74] sm:$0xf0] }
  0x7a   :  { %1248 = vmatpush.bf16.msrb.mxu3 %v2012_v59  ;;  %1260 = vmatpush.bf16.msra.mxu0 %v2120_v1  ;;  %v2336_v59 = vor.u32 %v2832_v44, %v2335_v43  ;;  %v2853_v1 = vld [vmem:[#allocation2 + $0x448] sm:$0xf0]  ;;  %v2519_v6 = vor.u32 %v2878_v58, %v2518_v57  ;;  %v2838_v43 = vld [vmem:[#allocation2 + $0x3d0] sm:$0xf0]  ;;  %v2495_v44 = vor.u32 %v2872_v37, %v2494_v36  ;;  %v2504_v58 = vld [vmem:[%s3418_s3 + $0x58] sm:$0xf0] }
  0x7b   :  { %v2515_v57 = vor.u32 %v2875_v55, %v2512_v56  ;;  %v2888_v55 = vld [vmem:[%s3418_s3 + $0xc4] sm:$0xf0]  ;;  %v2887_v56 = vld [vmem:[%s3418_s3 + $0xc4] sm:$0xf] }
  0x7c   :  { %1273 = vmatpush.bf16.msra.mxu2 %v2216_v4  ;;  %v2168_v4 = vor.u32 %v2790_v53, %v2167_v51  ;;  %v2523_v51 = vor.u32 %v2877_v45, %v2520_v46  ;;  %v2890_v45 = vld [vmem:[%s3418_s3 + $0xd4] sm:$0xf0]  ;;  %v2889_v46 = vld [vmem:[%s3418_s3 + $0xd4] sm:$0xf] }
  0x7d   :  { %1236 = vmatpush.bf16.msrb.mxu1 %v1904_v8  ;;  %v2420_v8 = vor.u32 %v2853_v1, %v2419_v0  ;;  %v2869_v1 = vld [vmem:[%s3418_s3 + $0x34] sm:$0xf] }
  0x7e   :  { %1249 = vmatpush.bf16.msrb.mxu3 %v2000_v9  ;;  %1261 = vmatpush.bf16.msra.mxu0 %v2108_v15  ;;  %v2311_v9 = vld [vmem:[#allocation2 + $0x368] sm:$0xf]  ;;  %v2408_v15 = vor.u32 %v2850_v12, %v2407_v11  ;;  %v2462_v11 = vld [vmem:[%s3418_s3] sm:$0xf] }
  0x7f   :  { %v2312_v13 = vor.u32 %v2826_v10, %v2311_v9  ;;  %v2867_v9 = vld [vmem:[%s3418_s3 + $0x24] sm:$0xf]  ;;  %v2480_v10 = vld [vmem:[%s3418_s3 + $0x28] sm:$0xf0]  ;;  %v2864_v12 = vld [vmem:[%s3418_s3 + $0x4] sm:$0xf0] }
  0x80   :  { %1274 = vmatpush.bf16.msra.mxu2 %v2204_v17 }
  0x81   :  { %1237 = vmatpush.bf16.msrb.mxu1 %v1892_v21  ;;  %v2300_v21 = vor.u32 %v2823_v18, %v2299_v16  ;;  %v2472_v18 = vld [vmem:[%s3418_s3 + $0x18] sm:$0xf0] }
  0x82   :  { %1250 = vmatpush.bf16.msrb.mxu3 %v1988_v22  ;;  %1262 = vmatpush.bf16.msra.mxu0 %v2096_v33  ;;  %v2396_v22 = vor.u32 %v2847_v20, %v2395_v19  ;;  %v2841_v33 = vld [vmem:[#allocation2 + $0x3e8] sm:$0xf0]  ;;  %v2582_v19 = vld [vmem:[%s3418_s3 + $0xf0] sm:$0xf]  ;;  %v2894_v20 = vld [vmem:[%s3418_s3 + $0xf4] sm:$0xf0] }
  0x83   :  { %v2583_v24 = vor.u32 %v2894_v20, %v2582_v19  ;;  %v2882_v19 = vld [vmem:[%s3418_s3 + $0x94] sm:$0xf0]  ;;  %v2881_v20 = vld [vmem:[%s3418_s3 + $0x94] sm:$0xf] }
  0x84   :  { %1275 = vmatpush.bf16.msra.mxu2 %v2192_v35 }
  0x85   :  { %1238 = vmatpush.bf16.msrb.mxu1 %v1880_v39  ;;  %v2372_v39 = vor.u32 %v2841_v33, %v2371_v31  ;;  %v2576_v31 = vld [vmem:[%s3418_s3 + $0xe8] sm:$0xf0] }
  0x86   :  { %1251 = vmatpush.bf16.msrb.mxu3 %v1976_v40  ;;  %1263 = vmatpush.bf16.msra.mxu0 %v2084_v47  ;;  %v2263_v40 = vld [vmem:[#allocation2 + $0x308] sm:$0xf] }
  0x88   :  { %1276 = vmatpush.bf16.msra.mxu2 %v2180_v50  ;;  %1239 = vmatmul.bf16.vlgmr.msrb.gmra.mxu1 %v3009_v54  ;;  %v2876_v54 = vld [vmem:[%s3418_s3 + $0x64] sm:$0xf0]  ;;  %v2870_v50 = vld [vmem:[%s3418_s3 + $0x34] sm:$0xf0] }
  0x89   :  { %1283 = vmatpush.bf16.msra.mxu1 %v2348_v41  ;;  %1252 = vmatmul.bf16.vlgmr.msrb.gmra.mxu3 %v3017_v3  ;;  %v2510_v3 = vld [vmem:[%s3418_s3 + $0x60] sm:$0xf]  ;;  %v2814_v41 = vld [vmem:[#allocation2 + $0x310] sm:$0xf0]  ;;  %v2487_v53 = vor.u32 %v2870_v50, %v2486_v49  ;;  %v2568_v49 = vld [vmem:[%s3418_s3 + $0xd8] sm:$0xf0] }
  0x8a   :  { %1296 = vmatpush.bf16.msra.mxu3 %v2444_v42  ;;  %1264 = vmatpush.bf16.msra.mxu0 %v2072_v2  ;;  %v2511_v17 = vor.u32 %v2876_v54, %v2510_v3  ;;  %v2359_v42 = vld [vmem:[#allocation2 + $0x3c8] sm:$0xf]  ;;  %v2264_v47 = vor.u32 %v2814_v41, %v2263_v40  ;;  %v2463_v54 = vor.u32 %v2864_v12, %v2462_v11  ;;  %v2544_v11 = vld [vmem:[%s3418_s3 + $0xa8] sm:$0xf0] }
  0x8b   :  { %v2360_v48 = vor.u32 %v2838_v43, %v2359_v42 }
  0x8c   :  { %1277 = vmatpush.bf16.msra.mxu2 %v2168_v4  ;;  %v2488_v4 = vld [vmem:[%s3418_s3 + $0x38] sm:$0xf0] }
  0x8d   :  { %1284 = vmatpush.bf16.msra.mxu1 %v2336_v59  ;;  %1265 = vmatmul.bf16.vlgmr.msra.gmra.mxu0 %v3011_v60  ;;  %v2817_v60 = vld [vmem:[#allocation2 + $0x328] sm:$0xf0] }
  0x8e   :  { %1297 = vmatpush.bf16.msra.mxu3 %v2432_v61  ;;  %1316 = vmatpush.bf16.msrb.mxu0 %v2456_v5  ;;  %v2276_v38 = vor.u32 %v2817_v60, %v2275_v30  ;;  %v2871_v61 = vld [vmem:[%s3418_s3 + $0x44] sm:$0xf]  ;;  %v2470_v5 = vld [vmem:[%s3418_s3 + $0x10] sm:$0xf]  ;;  %v2892_v30 = vld [vmem:[%s3418_s3 + $0xe4] sm:$0xf0] }
  0x8f   :  { %1278 = vmatmul.bf16.vlgmr.msra.gmra.mxu2 %v3023_v14  ;;  %v2502_v14 = vld [vmem:[%s3418_s3 + $0x50] sm:$0xf]  ;;  %v2891_v60 = vld [vmem:[%s3418_s3 + $0xe4] sm:$0xf] }
  0x90   :  { %1622 = vmatpush.bf16.msrb.mxu2 %v2519_v6  ;;  %v2503_v35 = vor.u32 %v2874_v34, %v2502_v14  ;;  %v2866_v6 = vld [vmem:[%s3418_s3 + $0x14] sm:$0xf0]  ;;  %v2863_v14 = vld [vmem:[%s3418_s3 + $0x4] sm:$0xf]  ;;  %v2464_v34 = vld [vmem:[%s3418_s3 + $0x8] sm:$0xf0]  ;;  %v2579_v37 = vor.u32 %v2891_v60, %v2576_v31 }
  0x91   :  { %1285 = vmatpush.bf16.msra.mxu1 %v2324_v7  ;;  %v2471_v7 = vor.u32 %v2866_v6, %v2470_v5  ;;  %v2528_v60 = vld [vmem:[%s3418_s3 + $0x88] sm:$0xf0] }
  0x92   :  { %1298 = vmatpush.bf16.msra.mxu3 %v2420_v8  ;;  %v2491_v8 = vor.u32 %v2869_v1, %v2488_v4  ;;  %1635 = vmatpush.bf16.msra.mxu0 %v2583_v24  ;;  %v2552_v4 = vld [vmem:[%s3418_s3 + $0xb8] sm:$0xf0] }
  0x94   :  { %1623 = vmatpush.bf16.msrb.mxu2 %v2511_v17  ;;  %v2865_v17 = vld [vmem:[%s3418_s3 + $0x14] sm:$0xf] }
  0x95   :  { %1286 = vmatpush.bf16.msra.mxu1 %v2312_v13  ;;  %v3149_v13 = vld [vmem:[%s3417_s2] sm:$0x7] }
  0x96   :  { %1299 = vmatpush.bf16.msra.mxu3 %v2408_v15  ;;  %v2483_v15 = vor.u32 %v2867_v9, %v2480_v10  ;;  %v2883_v9 = vld [vmem:[%s3418_s3 + $0xa4] sm:$0xf] }
  0x98   :  { %1624 = vmatpush.bf16.msrb.mxu2 %v2503_v35  ;;  %v2575_v35 = vor.u32 %v2892_v30, %v2574_v26  ;;  %v2526_v26 = vld [vmem:[%s3418_s3 + $0x80] sm:$0xf] }
  0x99   :  { %1287 = vmatpush.bf16.msra.mxu1 %v2300_v21  ;;  %v2893_v21 = vld [vmem:[%s3418_s3 + $0xf4] sm:$0xf] }
  0x9a   :  { %1300 = vmatpush.bf16.msra.mxu3 %v2396_v22  ;;  %v255_v22 = vperm.slane %v3149_v13, 0  ;;  %1636 = vmatpush.bf16.msra.mxu0 %v2575_v35 }
  0x9c   :  { %1625 = vmatpush.bf16.msrb.mxu2 %v2495_v44  ;;  %v2566_v44 = vld [vmem:[%s3418_s3 + $0xd0] sm:$0xf] }
  0x9d   :  { %1288 = vmatpush.bf16.msra.mxu1 %v2288_v28  ;;  %2459 = vmatmul.msk.bf16.vlgmr.msrb.gmra.mxu0 %vm1045_vm0, %v3030_v52  ;;  %v2873_v52 = vld [vmem:[%s3418_s3 + $0x54] sm:$0xf]  ;;  %v2475_v28 = vor.u32 %v2865_v17, %v2472_v18  ;;  %v2534_v18 = vld [vmem:[%s3418_s3 + $0x90] sm:$0xf] }
  0x9e   :  { %1301 = vmatpush.bf16.msra.mxu3 %v2384_v29  ;;  %v2507_v59 = vor.u32 %v2873_v52, %v2504_v58  ;;  %v2587_v29 = vor.u32 %v2893_v21, %v2584_v25  ;;  %v2560_v52 = vld [vmem:[%s3418_s3 + $0xc8] sm:$0xf0]  ;;  %v2535_v21 = vor.u32 %v2882_v19, %v2534_v18  ;;  %v2616_v18 = vld [vmem:[%s3418_s3 + $0x138] sm:$0xf0] }
  0xa0   :  { %1626 = vmatpush.bf16.msrb.mxu2 %v2487_v53  ;;  %v2558_v53 = vld [vmem:[%s3418_s3 + $0xc0] sm:$0xf] }
  0xa1   :  { %1289 = vmatpush.bf16.msra.mxu1 %v2276_v38 }
  0xa2   :  { %1302 = vmatpush.bf16.msra.mxu3 %v2372_v39  ;;  %v2467_v39 = vor.u32 %v2863_v14, %v2464_v34 }
  0xa4   :  { %v1058_v2 = vpop.f32.mrf.mxu0 }
  0xa5   :  { %1290 = vmatpush.bf16.msra.mxu1 %v2264_v47  ;;  %v1059_v38 = vadd.f32 %v1058_v2, %v255_v22  ;;  %v2536_v22 = vld [vmem:[%s3418_s3 + $0x98] sm:$0xf0] }
  0xa6   :  { %1303 = vmatpush.bf16.msra.mxu3 %v2360_v48  ;;  %v2567_v48 = vor.u32 %v2890_v45, %v2566_v44 }
  0xa7   :  { %v1071_v3 = vpop.f32.mrf.mxu1 }
  0xa8   :  { %1291 = vmatmul.bf16.vlgmr.msra.gmra.mxu1 %v3040_v27  ;;  %v2868_v27 = vld [vmem:[%s3418_s3 + $0x24] sm:$0xf0]  ;;  %v1072_v41 = vadd.f32 %v1071_v3, %v1059_v38  ;;  %1637 = vmatpush.bf16.msra.mxu0 %v2567_v48 }
  0xa9   :  { %1304 = vmatmul.bf16.vlgmr.msra.gmra.mxu3 %v3042_v32  ;;  %v2479_v0 = vor.u32 %v2868_v27, %v2478_v63  ;;  %v2499_v32 = vor.u32 %v2871_v61, %v2496_v62  ;;  %v2550_v27 = vld [vmem:[%s3418_s3 + $0xb0] sm:$0xf]  ;;  %v2908_v48 = vld [vmem:[%s3418_s3 + $0x164] sm:$0xf0] }
  0xaa   :  { %1661 = vmatpush.bf16.msrb.mxu3 %v2523_v51  ;;  %v2571_v51 = vor.u32 %v2889_v46, %v2568_v49  ;;  %v2648_v46 = vld [vmem:[%s3418_s3 + $0x178] sm:$0xf0] }
  0xab   :  { %1627 = vmatpush.bf16.msrb.mxu2 %v2479_v0  ;;  %v2886_v0 = vld [vmem:[%s3418_s3 + $0xb4] sm:$0xf0] }
  0xac   :  { %v1060_v16 = vpop.f32.mrf.mxu0  ;;  %v1097_v33 = vpop.f32.mrf.mxu3  ;;  %v2551_v2 = vor.u32 %v2886_v0, %v2550_v27 }
  0xae   :  { %1662 = vmatpush.bf16.msrb.mxu3 %v2515_v57  ;;  %v1084_v23 = vpop.f32.mrf.mxu2  ;;  %v2559_v57 = vor.u32 %v2888_v55, %v2558_v53  ;;  %v2640_v53 = vld [vmem:[%s3418_s3 + $0x168] sm:$0xf0] }
  0xaf   :  { %1628 = vmatpush.bf16.msrb.mxu2 %v2471_v7  ;;  %v1073_v36 = vpop.f32.mrf.mxu1  ;;  %v1085_v43 = vadd.f32 %v1084_v23, %v1072_v41  ;;  %v2542_v7 = vld [vmem:[%s3418_s3 + $0xa0] sm:$0xf]  ;;  %v2539_v23 = vor.u32 %v2881_v20, %v2536_v22  ;;  %v2646_v41 = vld [vmem:[%s3418_s3 + $0x170] sm:$0xf]  ;;  %v2899_v22 = vld [vmem:[%s3418_s3 + $0x124] sm:$0xf] }
  0xb0   :  { %1638 = vmatpush.bf16.msra.mxu0 %v2559_v57  ;;  %v2606_v20 = vld [vmem:[%s3418_s3 + $0x120] sm:$0xf] }
  0xb1   :  { %v1098_v50 = vadd.f32 %v1097_v33, %v1085_v43  ;;  %v256_v33 = vperm.slane %v3149_v13, 1  ;;  %v2909_v43 = vld [vmem:[%s3418_s3 + $0x174] sm:$0xf] }
  0xb2   :  { %1663 = vmatpush.bf16.msrb.mxu3 %v2507_v59  ;;  %v2563_v59 = vor.u32 %v2887_v56, %v2560_v52  ;;  %v2630_v52 = vld [vmem:[%s3418_s3 + $0x150] sm:$0xf] }
  0xb3   :  { %1629 = vmatpush.bf16.msrb.mxu2 %v2463_v54 }
  0xb4   :  { %v1099_v42 = vpop.f32.mrf.mxu3  ;;  %1639 = vmatpush.bf16.msra.mxu0 %v2551_v2  ;;  %v2904_v2 = vld [vmem:[%s3418_s3 + $0x144] sm:$0xf0] }
  0xb5   :  { %v2910_v42 = vld [vmem:[%s3418_s3 + $0x174] sm:$0xf0] }
  0xb6   :  { %1664 = vmatpush.bf16.msrb.mxu3 %v2499_v32  ;;  %v1086_v40 = vpop.f32.mrf.mxu2  ;;  %v2885_v32 = vld [vmem:[%s3418_s3 + $0xb4] sm:$0xf]  ;;  %v2647_v45 = vor.u32 %v2910_v42, %v2646_v41 }
  0xb7   :  { %1674 = vmatpush.bf16.msra.mxu2 %v2587_v29  ;;  %v2555_v6 = vor.u32 %v2885_v32, %v2552_v4  ;;  %v2879_v29 = vld [vmem:[%s3418_s3 + $0x84] sm:$0xf] }
  0xb8   :  { %v2531_v31 = vor.u32 %v2879_v29, %v2528_v60  ;;  %1648 = vmatpush.bf16.msrb.mxu1 %v2647_v45  ;;  %v2898_v29 = vld [vmem:[%s3418_s3 + $0x114] sm:$0xf0]  ;;  %v257_v45 = vperm.slane %v3149_v13, 2 }
  0xba   :  { %1665 = vmatpush.bf16.msrb.mxu3 %v2491_v8  ;;  %v2884_v8 = vld [vmem:[%s3418_s3 + $0xa4] sm:$0xf0] }
  0xbb   :  { %1675 = vmatpush.bf16.msra.mxu2 %v2579_v37  ;;  %v2543_v10 = vor.u32 %v2884_v8, %v2542_v7  ;;  %v2624_v7 = vld [vmem:[%s3418_s3 + $0x148] sm:$0xf0] }
  0xbd   :  { %1640 = vmatpush.bf16.msra.mxu0 %v2543_v10 }
  0xbe   :  { %1666 = vmatpush.bf16.msrb.mxu3 %v2483_v15  ;;  %v1136_v47 = vpop.f32.mrf.mxu2  ;;  %v2547_v15 = vor.u32 %v2883_v9, %v2544_v11 }
  0xbf   :  { %1676 = vmatpush.bf16.msra.mxu2 %v2571_v51  ;;  %v2907_v51 = vld [vmem:[%s3418_s3 + $0x164] sm:$0xf] }
  0xc0   :  { %v2643_v57 = vor.u32 %v2907_v51, %v2640_v53 }
  0xc1   :  { %1641 = vmatpush.bf16.msra.mxu0 %v2535_v21  ;;  %v2900_v21 = vld [vmem:[%s3418_s3 + $0x124] sm:$0xf0] }
  0xc2   :  { %1667 = vmatpush.bf16.msrb.mxu3 %v2475_v28  ;;  %v2880_v28 = vld [vmem:[%s3418_s3 + $0x84] sm:$0xf0] }
  0xc3   :  { %1677 = vmatpush.bf16.msra.mxu2 %v2563_v59  ;;  %v2527_v30 = vor.u32 %v2880_v28, %v2526_v26  ;;  %v2905_v59 = vld [vmem:[%s3418_s3 + $0x154] sm:$0xf]  ;;  %v2598_v28 = vld [vmem:[%s3418_s3 + $0x110] sm:$0xf] }
  0xc4   :  { %v1110_v58 = vpop.f32.mrf.mxu0  ;;  %v2599_v60 = vor.u32 %v2898_v29, %v2598_v28 }
  0xc5   :  { %v1111_v61 = vadd.f32 %v1110_v58, %v1098_v50  ;;  %1642 = vmatpush.bf16.msra.mxu0 %v2527_v30  ;;  %v2651_v50 = vor.u32 %v2909_v43, %v2648_v46  ;;  %v2906_v58 = vld [vmem:[%s3418_s3 + $0x154] sm:$0xf0]  ;;  %v2897_v30 = vld [vmem:[%s3418_s3 + $0x114] sm:$0xf] }
  0xc6   :  { %1668 = vmatpush.bf16.msrb.mxu3 %v2467_v39  ;;  %v1138_v1 = vpop.f32.mrf.mxu2 }
  0xc7   :  { %v1123_v62 = vpop.f32.mrf.mxu1  ;;  %1678 = vmatpush.bf16.msra.mxu2 %v2555_v6  ;;  %v2622_v1 = vld [vmem:[%s3418_s3 + $0x140] sm:$0xf]  ;;  %v2903_v6 = vld [vmem:[%s3418_s3 + $0x144] sm:$0xf] }
  0xc8   :  { %v1124_v63 = vadd.f32 %v1123_v62, %v1111_v61  ;;  %v2631_v62 = vor.u32 %v2906_v58, %v2630_v52  ;;  %v2623_v8 = vor.u32 %v2904_v2, %v2622_v1  ;;  %v2627_v10 = vor.u32 %v2903_v6, %v2624_v7  ;;  %v2918_v1 = vld [vmem:[%s3420_s5 + $0x38] sm:$0xff]  ;;  %v2916_v6 = vld [vmem:[%s3420_s5 + $0x28] sm:$0xff] }
  0xc9   :  { %1687 = vmatpush.bf16.msrb.mxu0 %v2651_v50  ;;  %v2926_v2 = vld [vmem:[%s3420_s5 + $0x78] sm:$0xff]  ;;  %v2924_v7 = vld [vmem:[%s3420_s5 + $0x68] sm:$0xff] }
  0xca   :  { %v1137_v5 = vadd.f32 %v1136_v47, %v1124_v63  ;;  %v2638_v47 = vld [vmem:[%s3418_s3 + $0x160] sm:$0xf]  ;;  %v2632_v63 = vld [vmem:[%s3418_s3 + $0x158] sm:$0xf0]  ;;  %1849 = vmatpush.bf16.msra.mxu3 %v2926_v2 }
  0xcb   :  { %1679 = vmatpush.bf16.msra.mxu2 %v2547_v15  ;;  %v2639_v55 = vor.u32 %v2908_v48, %v2638_v47  ;;  %v2635_v32 = vor.u32 %v2905_v59, %v2632_v63  ;;  %v2902_v15 = vld [vmem:[%s3418_s3 + $0x134] sm:$0xf0] }
  0xcc   :  { %v1322_v12 = vmax.f32 %v1137_v5, 0.0  ;;  %v1149_v3 = vpop.f32.mrf.mxu3  ;;  %v1112_v54 = vpop.f32.mrf.mxu0 }
  0xcd   :  { %v1150_v34 = vadd.f32 %v1149_v3, %v256_v33  ;;  %1649 = vmatpush.bf16.msrb.mxu1 %v2639_v55  ;;  %1688 = vmatpush.bf16.msrb.mxu0 %v2643_v57  ;;  %v2614_v54 = vld [vmem:[%s3418_s3 + $0x130] sm:$0xf] }
  0xce   :  { %v1325_v16 = vpack.c.bf16 %v1322_v12, %v1322_v12 }
  0xcf   :  { %v1125_v17 = vpop.f32.mrf.mxu1  ;;  %1680 = vmatpush.bf16.msra.mxu2 %v2539_v23  ;;  %v2607_v23 = vor.u32 %v2900_v21, %v2606_v20  ;;  %v2911_v20 = vld [vmem:[%s3420_s5] sm:$0xff] }
  0xd0   :  { %1630 = vmatmul.bf16.vlgmr.msrb.gmra.mxu2 %v1325_v16  ;;  %1669 = vmatmul.bf16.vlgmr.msrb.gmra.mxu3 %v1325_v16  ;;  %v2901_v16 = vld [vmem:[%s3418_s3 + $0x134] sm:$0xf]  ;;  %v2615_v17 = vor.u32 %v2902_v15, %v2614_v54  ;;  %v2919_v21 = vld [vmem:[%s3420_s5 + $0x40] sm:$0xff] }
  0xd1   :  { %1650 = vmatpush.bf16.msrb.mxu1 %v2631_v62  ;;  %1689 = vmatpush.bf16.msrb.mxu0 %v2635_v32  ;;  %v2619_v19 = vor.u32 %v2901_v16, %v2616_v18  ;;  %v2921_v54 = vld [vmem:[%s3420_s5 + $0x50] sm:$0xff]  ;;  %v2912_v18 = vld [vmem:[%s3420_s5 + $0x8] sm:$0xff] }
  0xd2   :  { %v1162_v24 = vpop.f32.mrf.mxu2 }
  0xd3   :  { %1681 = vmatpush.bf16.msra.mxu2 %v2531_v31  ;;  %v1163_v35 = vadd.f32 %v1162_v24, %v1150_v34  ;;  %v2608_v24 = vld [vmem:[%s3418_s3 + $0x128] sm:$0xf0]  ;;  %v2600_v31 = vld [vmem:[%s3418_s3 + $0x118] sm:$0xf0]  ;;  %v2590_v34 = vld [vmem:[%s3418_s3 + $0x100] sm:$0xf] }
  0xd4   :  { %v1151_v25 = vpop.f32.mrf.mxu3  ;;  %v2611_v26 = vor.u32 %v2899_v22, %v2608_v24  ;;  %v2603_v33 = vor.u32 %v2897_v30, %v2600_v31  ;;  %v1376_v22 = vld [vmem:[%s3419_s4] sm:$0x3] }
  0xd5   :  { %1651 = vmatpush.bf16.msrb.mxu1 %v2623_v8  ;;  %1690 = vmatpush.bf16.msrb.mxu0 %v2627_v10  ;;  %v2915_v8 = vld [vmem:[%s3420_s5 + $0x20] sm:$0xff]  ;;  %v2914_v10 = vld [vmem:[%s3420_s5 + $0x18] sm:$0xff]  ;;  %v1379_v24 = vperm.slane %v1376_v22, 1 }
  0xd9   :  { %1652 = vmatpush.bf16.msrb.mxu1 %v2615_v17  ;;  %1691 = vmatpush.bf16.msrb.mxu0 %v2619_v19  ;;  %v2920_v19 = vld [vmem:[%s3420_s5 + $0x48] sm:$0xff] }
  0xda   :  { %v1164_v14 = vpop.f32.mrf.mxu2 }
  0xdd   :  { %1653 = vmatpush.bf16.msrb.mxu1 %v2607_v23  ;;  %1692 = vmatpush.bf16.msrb.mxu0 %v2611_v26  ;;  %v1378_v23 = vperm.slane %v1376_v22, 0 }
  0xe1   :  { %1654 = vmatpush.bf16.msrb.mxu1 %v2599_v60  ;;  %1693 = vmatpush.bf16.msrb.mxu0 %v2603_v33 }
  0xe4   :  { %v1175_v36 = vpop.f32.mrf.mxu0 }
  0xe5   :  { %v1188_v37 = vpop.f32.mrf.mxu1  ;;  %v1176_v38 = vadd.f32 %v1175_v36, %v1163_v35  ;;  %v2896_v35 = vld [vmem:[%s3418_s3 + $0x104] sm:$0xf0]  ;;  %v2895_v36 = vld [vmem:[%s3418_s3 + $0x104] sm:$0xf] }
  0xe7   :  { %v1189_v39 = vadd.f32 %v1188_v37, %v1176_v38  ;;  %v2591_v38 = vor.u32 %v2896_v35, %v2590_v34 }
  0xe9   :  { %1655 = vmatpush.bf16.msrb.mxu1 %v2591_v38 }
  0xec   :  { %v1201_v40 = vpop.f32.mrf.mxu3  ;;  %v1177_v44 = vpop.f32.mrf.mxu0 }
  0xed   :  { %v1190_v49 = vpop.f32.mrf.mxu1  ;;  %v1202_v56 = vadd.f32 %v1201_v40, %v1189_v39  ;;  %v2592_v39 = vld [vmem:[%s3418_s3 + $0x108] sm:$0xf0]  ;;  %1836 = vmatpush.bf16.msra.mxu1 %v2918_v1 }
  0xee   :  { %v2595_v41 = vor.u32 %v2895_v36, %v2592_v39 }
  0xf0   :  { %1694 = vmatpush.bf16.msrb.mxu0 %v2595_v41 }
  0xf2   :  { %v1214_v61 = vpop.f32.mrf.mxu2 }
  0xf3   :  { %v1215_v27 = vadd.f32 %v1214_v61, %v1202_v56 }
  0xf4   :  { %v1203_v0 = vpop.f32.mrf.mxu3  ;;  %v1227_v4 = vpop.f32.mrf.mxu0 }
  0xf5   :  { %v1228_v5 = vadd.f32 %v1227_v4, %v1215_v27  ;;  %v2917_v4 = vld [vmem:[%s3420_s5 + $0x30] sm:$0xff] }
  0xf6   :  { %1837 = vmatpush.bf16.msra.mxu1 %v2917_v4 }
  0xf7   :  { %v1323_v9 = vmax.f32 %v1228_v5, 0.0  ;;  %v2925_v5 = vld [vmem:[%s3420_s5 + $0x70] sm:$0xff] }
  0xf8   :  { %1850 = vmatpush.bf16.msra.mxu3 %v2925_v5 }
  0xf9   :  { %v1326_v11 = vpack.c.bf16 %v1323_v9, %v1323_v9  ;;  %v2923_v9 = vld [vmem:[%s3420_s5 + $0x60] sm:$0xff] }
  0xfa   :  { %v1216_v12 = vpop.f32.mrf.mxu2  ;;  %1838 = vmatpush.bf16.msra.mxu1 %v2916_v6 }
  0xfb   :  { %1643 = vmatmul.bf16.vlgmr.msra.gmra.mxu0 %v1326_v11  ;;  %1682 = vmatmul.bf16.vlgmr.msra.gmra.mxu2 %v1326_v11  ;;  %v2922_v11 = vld [vmem:[%s3420_s5 + $0x58] sm:$0xff] }
  0xfc   :  { %v1229_v3 = vpop.f32.mrf.mxu0  ;;  %1851 = vmatpush.bf16.msra.mxu3 %v2924_v7 }
  0xfd   :  { %v2913_v3 = vld [vmem:[%s3420_s5 + $0x10] sm:$0xff] }
  0xfe   :  { %1839 = vmatpush.bf16.msra.mxu1 %v2915_v8 }
 0x100   :  { %1852 = vmatpush.bf16.msra.mxu3 %v2923_v9 }
 0x102   :  { %1840 = vmatpush.bf16.msra.mxu1 %v2914_v10 }
 0x104   :  { %1853 = vmatpush.bf16.msra.mxu3 %v2922_v11 }
 0x105   :  { %v1240_v25 = vpop.f32.mrf.mxu1 }
 0x106   :  { %v1241_v46 = vadd.f32 %v1240_v25, %v257_v45  ;;  %1841 = vmatpush.bf16.msra.mxu1 %v2913_v3 }
 0x108   :  { %1854 = vmatpush.bf16.msra.mxu3 %v2921_v54 }
 0x10a   :  { %v1266_v37 = vpop.f32.mrf.mxu0  ;;  %1842 = vmatpush.bf16.msra.mxu1 %v2912_v18 }
 0x10c   :  { %v1253_v14 = vpop.f32.mrf.mxu3  ;;  %1855 = vmatpush.bf16.msra.mxu3 %v2920_v19 }
 0x10d   :  { %v1242_v40 = vpop.f32.mrf.mxu1  ;;  %v1254_v49 = vadd.f32 %v1253_v14, %v1241_v46 }
 0x10e   :  { %1843 = vmatpush.bf16.msra.mxu1 %v2911_v20  ;;  %v2930_v40 = vld [vmem:[%s3421_s6] ss:$0 sm:$0xff] }
 0x10f   :  { %v1267_v50 = vadd.f32 %v1266_v37, %v1254_v49 }
 0x110   :  { %1856 = vmatpush.bf16.msra.mxu3 %v2919_v21 }
 0x112   :  { %v1279_v42 = vpop.f32.mrf.mxu2  ;;  %v1268_v44 = vpop.f32.mrf.mxu0 }
 0x113   :  { %v1280_v55 = vadd.f32 %v1279_v42, %v1267_v50 }
 0x114   :  { %v1255_v43 = vpop.f32.mrf.mxu3 }
 0x11a   :  { %v1281_v47 = vpop.f32.mrf.mxu2  ;;  %v1318_v48 = vpop.f32.mrf.mxu0 }
 0x122   :  { %v1320_v53 = vpop.f32.mrf.mxu0 }
 0x125   :  { %v1292_v51 = vpop.f32.mrf.mxu1 }
 0x126   :  { %v1293_v56 = vadd.f32 %v1292_v51, %v1280_v55 }
 0x12c   :  { %v1305_v57 = vpop.f32.mrf.mxu3 }
 0x12d   :  { %v1306_v52 = vadd.f32 %v1305_v57, %v1293_v56  ;;  %v1294_v58 = vpop.f32.mrf.mxu1 }
 0x12f   :  { %v1319_v59 = vadd.f32 %v1318_v48, %v1306_v52 }
 0x131   :  { %v1324_v61 = vmax.f32 %v1319_v59, 0.0 }
 0x133   :  { %v1327_v62 = vpack.c.bf16 %v1324_v61, %v1324_v61 }
 0x134   :  { %v1307_v63 = vpop.f32.mrf.mxu3 }
 0x135   :  { %1656 = vmatmul.bf16.vlgmr.msrb.gmra.mxu1 %v1327_v62  ;;  %1695 = vmatmul.bf16.vlgmr.msrb.gmra.mxu0 %v1327_v62 }
 0x153   :  { %v1631_v27 = vpop.f32.mrf.mxu2  ;;  %v1670_v13 = vpop.f32.mrf.mxu3 }
 0x154   :  { %v1632_v25 = vadd.f32 %v1631_v27, %v1378_v23  ;;  %v1671_v26 = vadd.f32 %v1670_v13, %v1379_v24 }
 0x15b   :  { %v1633_v0 = vpop.f32.mrf.mxu2  ;;  %v1672_v32 = vpop.f32.mrf.mxu3 }
 0x178   :  { %v1644_v12 = vpop.f32.mrf.mxu0 }
 0x179   :  { %v1645_v28 = vadd.f32 %v1644_v12, %v1632_v25 }
 0x17e   :  { %v1683_v15 = vpop.f32.mrf.mxu2 }
 0x17f   :  { %v1684_v29 = vadd.f32 %v1683_v15, %v1671_v26 }
 0x180   :  { %v1646_v16 = vpop.f32.mrf.mxu0 }
 0x186   :  { %v1685_v17 = vpop.f32.mrf.mxu2 }
 0x1b2   :  { %v1657_v30 = vpop.f32.mrf.mxu1  ;;  %v1696_v60 = vpop.f32.mrf.mxu0 }
 0x1b3   :  { %v1658_v31 = vadd.f32 %v1657_v30, %v1645_v28  ;;  %v1697_v33 = vadd.f32 %v1696_v60, %v1684_v29 }
 0x1b5   :  { %v1700_v14 = vmax.f32 %v1658_v31, 0.0  ;;  %v1701_v34 = vmax.f32 %v1697_v33, 0.0 }
 0x1b7   :  { %v1702_v35 = vpack.c.bf16 %v1700_v14, %v1700_v14  ;;  %v1703_v36 = vpack.c.bf16 %v1701_v34, %v1701_v34 }
 0x1b9   :  { %1844 = vmatmul.bf16.vlgmr.msra.gmra.mxu1 %v1702_v35  ;;  %1857 = vmatmul.bf16.vlgmr.msra.gmra.mxu3 %v1703_v36 }
 0x1ba   :  { %v1659_v37 = vpop.f32.mrf.mxu1  ;;  %v1698_v38 = vpop.f32.mrf.mxu0 }
 0x236   :  { %v1845_v39 = vpop.f32.mrf.mxu1 }
 0x237   :  { %v1846_v41 = vadd.f32 %v2930_v40, %v1845_v39 }
 0x23c   :  { %v1858_v42 = vpop.f32.mrf.mxu3 }
 0x23d   :  { %v1859_v43 = vadd.f32 %v1858_v42, %v1846_v41 }
 0x23e   :  { %v1847_v44 = vpop.f32.mrf.mxu1 }
 0x23f   :  { %v1862_v45 = vpack.c.bf16 %v1859_v43, %v1859_v43 }
 0x241   :  { %1863 = vst [vmem:[%s3422_s7] sm:$0xf] %v1862_v45 }
 0x244   :  { %v1860_v46 = vpop.f32.mrf.mxu3 }
 0x245   :  { %1868 = vsyncpa [#allocation3], 1 }

</bundles_post_ra>
